<compile_context>
chip_gen: v7x
topology: tpu7x:2x2x1
jax: 0.10.0
libtpu: 0.0.40
codegen_flags: <defaults>
</compile_context>

<pallas_src>
import functools

import jax
import jax.numpy as jnp
import numpy as np
from jax.experimental import pallas as pl
from jax.experimental.pallas import tpu as pltpu

# Color-space matrices (identical constants to the torch reference).
_M = np.array(
    [[0.66666, 1.0, -0.5],
     [0.66666, 0.0, 1.0],
     [0.66666, -1.0, -0.5]], dtype=np.float32)
_M_INV = np.linalg.inv(_M).astype(np.float32)


def _weighted_avg_color_kernel(x_ref, xp_ref, out_ref,
                               a_scr, b_scr, ap_scr, bp_scr, lp_scr,
                               *, W, S, band_h, patch_size, neg_inv_alpha):
  pad = patch_size // 2
  band = pl.program_id(1)
  n_bands = pl.num_programs(1)
  r_base = band * band_h            # first image row handled by this band

  # RGB -> PCA mixing constants (pca_i = sum_j M[j, i] * (rgb_j - 0.5)).
  m00, m10, m20 = (float(_M[j, 0]) for j in range(3))
  m01, m11, m21 = (float(_M[j, 1]) for j in range(3))
  m02, m12, m22 = (float(_M[j, 2]) for j in range(3))

  def chroma(ref, rows):
    r = ref[0, 0, rows, :] - 0.5
    g = ref[0, 1, rows, :] - 0.5
    b = ref[0, 2, rows, :] - 0.5
    return (m01 * r + m11 * g + m21 * b,
            m02 * r + m12 * g + m22 * b)

  # ---------------------------------------------------------------------
  # Pass 1: PCA chroma of both images for this band into row-haloed VMEM
  # scratch, plus the prediction luma (computed once, reused in pass 2).
  # ---------------------------------------------------------------------
  def pca_strip(s, carry):
    off = pl.multiple_of(s * S, S)
    rows_in = pl.ds(r_base + off, S)
    rp = xp_ref[0, 0, rows_in, :] - 0.5
    gp = xp_ref[0, 1, rows_in, :] - 0.5
    bp = xp_ref[0, 2, rows_in, :] - 0.5
    a, b = chroma(x_ref, rows_in)
    dst = pl.ds(off + pad, S)
    a_scr[dst, :] = a
    b_scr[dst, :] = b
    ap_scr[dst, :] = m01 * rp + m11 * gp + m21 * bp
    bp_scr[dst, :] = m02 * rp + m12 * gp + m22 * bp
    lp_scr[pl.ds(off, S), :] = m00 * rp + m10 * gp + m20 * bp
    return carry

  jax.lax.fori_loop(0, band_h // S, pca_strip, 0)

  zeros_halo = jnp.zeros((pad, W), jnp.float32)

  # Top halo rows: zeros at the image border (F.unfold zero padding in PCA
  # space), otherwise the last rows of the band above.
  @pl.when(band == 0)
  def _():
    for scr in (a_scr, b_scr, ap_scr, bp_scr):
      scr[pl.ds(0, pad), :] = zeros_halo

  @pl.when(band > 0)
  def _():
    rows_in = pl.ds(r_base - pad, pad)
    a, b = chroma(x_ref, rows_in)
    ap, bp = chroma(xp_ref, rows_in)
    a_scr[pl.ds(0, pad), :] = a
    b_scr[pl.ds(0, pad), :] = b
    ap_scr[pl.ds(0, pad), :] = ap
    bp_scr[pl.ds(0, pad), :] = bp

  # Bottom halo rows.
  @pl.when(band == n_bands - 1)
  def _():
    for scr in (a_scr, b_scr, ap_scr, bp_scr):
      scr[pl.ds(band_h + pad, pad), :] = zeros_halo

  @pl.when(band < n_bands - 1)
  def _():
    rows_in = pl.ds(r_base + band_h, pad)
    a, b = chroma(x_ref, rows_in)
    ap, bp = chroma(xp_ref, rows_in)
    a_scr[pl.ds(band_h + pad, pad), :] = a
    b_scr[pl.ds(band_h + pad, pad), :] = b
    ap_scr[pl.ds(band_h + pad, pad), :] = ap
    bp_scr[pl.ds(band_h + pad, pad), :] = bp

  # ---------------------------------------------------------------------
  # Pass 2: per 8-row strip weighted average (register-resident accumulators).
  # Hoisted invariants (JAX does not CSE broadcasts inside loops).
  # ---------------------------------------------------------------------
  col_idx = jax.lax.broadcasted_iota(jnp.int32, (S, W), 1)
  col_mask = {}
  for dx in range(patch_size):
    dx_off = dx - pad
    if dx_off != 0:
      col_mask[dx_off] = (col_idx >= -dx_off) & (col_idx < W - dx_off)
  ones_sw = jnp.ones((S, W), jnp.float32)

  def smooth_strip(s, carry):
    off = pl.multiple_of(s * S, S)
    rows_c = pl.ds(off + pad, S)
    a_c = a_scr[rows_c, :]
    b_c = b_scr[rows_c, :]
    ap_c = ap_scr[rows_c, :]
    bp_c = bp_scr[rows_c, :]
    d_oob = a_c * a_c + b_c * b_c     # distance to a zero-padded neighbour

    # Center tap (dy == dx == pad): distance 0 -> weight exactly 1.
    denom = ones_sw
    num_a = ap_c
    num_b = bp_c

    for dy in range(patch_size):
      if dy == pad:
        # Reuse already-loaded center rows (no redundant misaligned loads).
        a_dy, b_dy, ap_dy, bp_dy = a_c, b_c, ap_c, bp_c
      else:
        rows_dy = pl.ds(off + dy, S)            # sublane window shift
        a_dy = a_scr[rows_dy, :]
        b_dy = b_scr[rows_dy, :]
        ap_dy = ap_scr[rows_dy, :]
        bp_dy = bp_scr[rows_dy, :]
      for dx in range(patch_size):
        dx_off = dx - pad
        if dy == pad and dx_off == 0:
          continue                               # center tap handled above
        if dx_off == 0:
          d = (a_dy - a_c) ** 2 + (b_dy - b_c) ** 2
          w = jnp.exp(d * neg_inv_alpha)
          denom = denom + w
          num_a = num_a + w * ap_dy
          num_b = num_b + w * bp_dy
        else:
          shift = (-dx_off) % W                  # neighbour[j] = x[j + dx_off]
          m = col_mask[dx_off]
          la = pltpu.roll(a_dy, shift, axis=1)
          lb = pltpu.roll(b_dy, shift, axis=1)
          lap = pltpu.roll(ap_dy, shift, axis=1)
          lbp = pltpu.roll(bp_dy, shift, axis=1)
          d = (la - a_c) ** 2 + (lb - b_c) ** 2
          d = jnp.where(m, d, d_oob)             # OOB tap == zero-valued tap
          w = jnp.exp(d * neg_inv_alpha)
          denom = denom + w                      # full weight in denominator
          wm = jnp.where(m, w, 0.0)              # ...but 0 in the numerator
          num_a = num_a + wm * lap
          num_b = num_b + wm * lbp

    inv = 1.0 / denom   # exact; approx reciprocal rejected for 1e-4 tolerance
    a_s = num_a * inv
    b_s = num_b * inv
    l_p = lp_scr[pl.ds(off, S), :]               # prediction luma (pass 1)

    rows_out = pl.ds(off, S)
    # PCA -> RGB: rgb_c = sum_i M_inv[i, c] * pca_i + 0.5
    for c in range(3):
      out_ref[0, c, rows_out, :] = (float(_M_INV[0, c]) * l_p
                                    + float(_M_INV[1, c]) * a_s
                                    + float(_M_INV[2, c]) * b_s
                                    + 0.5)
    return carry

  jax.lax.fori_loop(0, band_h // S, smooth_strip, 0)


def _pick_band_h(h_core):
  """Largest multiple-of-8 divisor of h_core that is <= 32 (and gives >=2
  bands whenever possible, so v7x's two TensorCores both get work at N==1)."""
  limit = 32 if h_core >= 64 else max(8, h_core // 2)
  band_h = 8
  for cand in range(8, limit + 1, 8):
    if h_core % cand == 0:
      band_h = cand
  return band_h


def weighted_average_color(x_rgb, x_rgb_predict, patch_size=3, alpha=1.0):
  N, C, H, W = x_rgb.shape
  assert C == 3 and x_rgb_predict.shape == x_rgb.shape
  assert patch_size % 2 == 1
  pad = patch_size // 2

  # Pad H to a multiple of 8 (sublanes) and W to a multiple of 128 (lanes)
  # with the constant 0.5: RGB 0.5 maps to PCA (0,0,0), i.e. exactly the
  # zero padding F.unfold applies, so results for real pixels are exact.
  # Production 256x256 needs no padding at all (and no extra HBM traffic).
  H_core = H + (-H) % 8
  W_core = W + (-W) % 128
  x = x_rgb.astype(jnp.float32)
  xp = x_rgb_predict.astype(jnp.float32)
  if (H_core, W_core) != (H, W):
    padding = ((0, 0), (0, 0), (0, H_core - H), (0, W_core - W))
    x = jnp.pad(x, padding, constant_values=0.5)
    xp = jnp.pad(xp, padding, constant_values=0.5)

  S = 8                                    # row-strip height (stay at 8)
  band_h = _pick_band_h(H_core)
  n_bands = H_core // band_h

  kernel = functools.partial(
      _weighted_avg_color_kernel, W=W_core, S=S, band_h=band_h,
      patch_size=patch_size, neg_inv_alpha=-1.0 / float(alpha))

  # Inputs: whole-image block, constant across the band axis (fetched once
  # per image per core).  Output: one lane-dense row band per grid step.
  in_spec = pl.BlockSpec((1, 3, H_core, W_core), lambda n, b: (n, 0, 0, 0))
  out_spec = pl.BlockSpec((1, 3, band_h, W_core), lambda n, b: (n, 0, b, 0))

  out = pl.pallas_call(
      kernel,
      out_shape=jax.ShapeDtypeStruct((N, 3, H_core, W_core), jnp.float32),
      grid=(N, n_bands),
      in_specs=[in_spec, in_spec],
      out_specs=out_spec,
      scratch_shapes=(
          [pltpu.VMEM((band_h + 2 * pad, W_core), jnp.float32)
           for _ in range(4)]                      # a, b, a_pred, b_pred
          + [pltpu.VMEM((band_h, W_core), jnp.float32)]),   # luma_pred
      compiler_params=pltpu.CompilerParams(
          dimension_semantics=("parallel", "parallel")),
  )(x, xp)

  if (H_core, W_core) != (H, W):
    out = out[:, :, :H, :W]
  return out


def _reference(x_rgb, x_rgb_pred, patch_size=3, alpha=1.0):
  # Pure-JAX mirror of the PyTorch forward, for validation.
  pad = patch_size // 2
  M = jnp.asarray(_M)

  def rgb2pca(x):
    return jnp.einsum("ji,njhw->nihw", M, x - 0.5)

  x_pca = rgb2pca(x_rgb)
  x_pca_p = rgb2pca(x_rgb_pred)
  a = x_pca[:, 1:2]
  b = x_pca[:, 2:3]

  def unfold(t):  # (N,1,H,W) -> (N, k*k, H, W), zero-padded, F.unfold order
    N, _, H, W = t.shape
    tp = jnp.pad(t, ((0, 0), (0, 0), (pad, pad), (pad, pad)))
    patches = [tp[:, 0, dy:dy + H, dx:dx + W]
               for dy in range(patch_size) for dx in range(patch_size)]
    return jnp.stack(patches, axis=1)

  la, lb = unfold(a), unfold(b)
  lap = unfold(x_pca_p[:, 1:2])
  lbp = unfold(x_pca_p[:, 2:3])
  diff = (la - a) ** 2 + (lb - b) ** 2
  corr = jax.nn.softmax(-diff / alpha, axis=1)
  sm_a = jnp.sum(corr * lap, axis=1, keepdims=True)
  sm_b = jnp.sum(corr * lbp, axis=1, keepdims=True)
  smoothed = jnp.concatenate([x_pca_p[:, 0:1], sm_a, sm_b], axis=1)
  return jnp.einsum("ij,nihw->njhw", jnp.asarray(_M_INV), smoothed) + 0.5


if __name__ == "__main__":
  key = jax.random.PRNGKey(0)

  def check(N, H, W, patch_size=3, alpha=1.0):
    k1, k2 = jax.random.split(jax.random.fold_in(key, 131 * H + W))
    x = jax.random.uniform(k1, (N, 3, H, W), dtype=jnp.float32)
    xp = jax.random.uniform(k2, (N, 3, H, W), dtype=jnp.float32)
    out = jax.block_until_ready(
        weighted_average_color(x, xp, patch_size=patch_size, alpha=alpha))
    assert out.shape == (N, 3, H, W), out.shape
    ref = _reference(x, xp, patch_size=patch_size, alpha=alpha)
    err = float(jnp.max(jnp.abs(out - ref)))
    assert err < 1e-4, f"shape ({N},3,{H},{W}): max abs error {err}"

  check(2, 64, 128)    # multi-band grid, lane-dense W, no wrapper padding
  check(1, 256, 256)   # production resolution: multi-vreg rows, 8 row bands
  check(1, 30, 96)     # unaligned H/W -> 0.5-padding + crop fallback path
  print("KERNEL_OK")
</pallas_src>

<mosaic_0001>
module attributes {stable_mosaic.version = 11 : i64} {
  func.func @_weighted_avg_color_kernel(%arg0: i32, %arg1: i32, %arg2: memref<1x3x64x128xf32, #tpu.memory_space<vmem>>, %arg3: memref<1x3x64x128xf32, #tpu.memory_space<vmem>>, %arg4: memref<1x3x32x128xf32, #tpu.memory_space<vmem>>, %arg5: memref<34x128xf32, #tpu.memory_space<vmem>>, %arg6: memref<34x128xf32, #tpu.memory_space<vmem>>, %arg7: memref<34x128xf32, #tpu.memory_space<vmem>>, %arg8: memref<34x128xf32, #tpu.memory_space<vmem>>, %arg9: memref<32x128xf32, #tpu.memory_space<vmem>>) attributes {dimension_semantics = [#tpu.dimension_semantics<parallel>, #tpu.dimension_semantics<parallel>], iteration_bounds = array<i64: 2, 2>, scalar_prefetch = 0 : i64, scratch_operands = 5 : i64, tpu.core_type = #tpu.core_type<tc>, window_params = [{transform_indices = @transform_0, window_bounds = array<i64: 1, 3, 64, 128>}, {transform_indices = @transform_1, window_bounds = array<i64: 1, 3, 64, 128>}, {transform_indices = @transform_2, window_bounds = array<i64: 1, 3, 32, 128>}]} {
    %c32_i32 = arith.constant 32 : i32
    %0 = arith.muli %arg1, %c32_i32 : i32
    %c0_i32 = arith.constant 0 : i32
    %c4_i32 = arith.constant 4 : i32
    %1 = arith.addi %c0_i32, %c4_i32 : i32
    %c1_i32 = arith.constant 1 : i32
    scf.for %arg10 = %c0_i32 to %1 step %c1_i32  : i32 {
      %c8_i32 = arith.constant 8 : i32
      %28 = arith.muli %arg10, %c8_i32 : i32
      %29 = tpu.assume_multiple %28, 8 : i32
      %30 = arith.addi %0, %29 : i32
      %c0 = arith.constant 0 : index
      %c0_15 = arith.constant 0 : index
      %31 = arith.index_cast %30 : i32 to index
      %c0_16 = arith.constant 0 : index
      %32 = vector.load %arg3[%c0, %c0_15, %31, %c0_16] : memref<1x3x64x128xf32, #tpu.memory_space<vmem>>, vector<1x1x8x128xf32>
      %33 = vector.shape_cast %32 : vector<1x1x8x128xf32> to vector<8x128xf32>
      %cst_17 = arith.constant 5.000000e-01 : f32
      %34 = vector.broadcast %cst_17 : f32 to vector<8x128xf32>
      %35 = arith.subf %33, %34 : vector<8x128xf32>
      %c0_18 = arith.constant 0 : index
      %c1 = arith.constant 1 : index
      %36 = arith.index_cast %30 : i32 to index
      %c0_19 = arith.constant 0 : index
      %37 = vector.load %arg3[%c0_18, %c1, %36, %c0_19] : memref<1x3x64x128xf32, #tpu.memory_space<vmem>>, vector<1x1x8x128xf32>
      %38 = vector.shape_cast %37 : vector<1x1x8x128xf32> to vector<8x128xf32>
      %cst_20 = arith.constant 5.000000e-01 : f32
      %39 = vector.broadcast %cst_20 : f32 to vector<8x128xf32>
      %40 = arith.subf %38, %39 : vector<8x128xf32>
      %c0_21 = arith.constant 0 : index
      %c2 = arith.constant 2 : index
      %41 = arith.index_cast %30 : i32 to index
      %c0_22 = arith.constant 0 : index
      %42 = vector.load %arg3[%c0_21, %c2, %41, %c0_22] : memref<1x3x64x128xf32, #tpu.memory_space<vmem>>, vector<1x1x8x128xf32>
      %43 = vector.shape_cast %42 : vector<1x1x8x128xf32> to vector<8x128xf32>
      %cst_23 = arith.constant 5.000000e-01 : f32
      %44 = vector.broadcast %cst_23 : f32 to vector<8x128xf32>
      %45 = arith.subf %43, %44 : vector<8x128xf32>
      %c0_24 = arith.constant 0 : index
      %c0_25 = arith.constant 0 : index
      %46 = arith.index_cast %30 : i32 to index
      %c0_26 = arith.constant 0 : index
      %47 = vector.load %arg2[%c0_24, %c0_25, %46, %c0_26] : memref<1x3x64x128xf32, #tpu.memory_space<vmem>>, vector<1x1x8x128xf32>
      %48 = vector.shape_cast %47 : vector<1x1x8x128xf32> to vector<8x128xf32>
      %cst_27 = arith.constant 5.000000e-01 : f32
      %49 = vector.broadcast %cst_27 : f32 to vector<8x128xf32>
      %50 = arith.subf %48, %49 : vector<8x128xf32>
      %c0_28 = arith.constant 0 : index
      %c1_29 = arith.constant 1 : index
      %51 = arith.index_cast %30 : i32 to index
      %c0_30 = arith.constant 0 : index
      %52 = vector.load %arg2[%c0_28, %c1_29, %51, %c0_30] : memref<1x3x64x128xf32, #tpu.memory_space<vmem>>, vector<1x1x8x128xf32>
      %53 = vector.shape_cast %52 : vector<1x1x8x128xf32> to vector<8x128xf32>
      %cst_31 = arith.constant 5.000000e-01 : f32
      %54 = vector.broadcast %cst_31 : f32 to vector<8x128xf32>
      %55 = arith.subf %53, %54 : vector<8x128xf32>
      %c0_32 = arith.constant 0 : index
      %c2_33 = arith.constant 2 : index
      %56 = arith.index_cast %30 : i32 to index
      %c0_34 = arith.constant 0 : index
      %57 = vector.load %arg2[%c0_32, %c2_33, %56, %c0_34] : memref<1x3x64x128xf32, #tpu.memory_space<vmem>>, vector<1x1x8x128xf32>
      %58 = vector.shape_cast %57 : vector<1x1x8x128xf32> to vector<8x128xf32>
      %cst_35 = arith.constant 5.000000e-01 : f32
      %59 = vector.broadcast %cst_35 : f32 to vector<8x128xf32>
      %60 = arith.subf %58, %59 : vector<8x128xf32>
      %cst_36 = arith.constant 1.000000e+00 : f32
      %61 = vector.broadcast %cst_36 : f32 to vector<8x128xf32>
      %62 = arith.mulf %61, %50 : vector<8x128xf32>
      %cst_37 = arith.constant 0.000000e+00 : f32
      %63 = vector.broadcast %cst_37 : f32 to vector<8x128xf32>
      %64 = arith.mulf %63, %55 : vector<8x128xf32>
      %65 = arith.addf %62, %64 : vector<8x128xf32>
      %cst_38 = arith.constant -1.000000e+00 : f32
      %66 = vector.broadcast %cst_38 : f32 to vector<8x128xf32>
      %67 = arith.mulf %66, %60 : vector<8x128xf32>
      %68 = arith.addf %65, %67 : vector<8x128xf32>
      %cst_39 = arith.constant -5.000000e-01 : f32
      %69 = vector.broadcast %cst_39 : f32 to vector<8x128xf32>
      %70 = arith.mulf %69, %50 : vector<8x128xf32>
      %cst_40 = arith.constant 1.000000e+00 : f32
      %71 = vector.broadcast %cst_40 : f32 to vector<8x128xf32>
      %72 = arith.mulf %71, %55 : vector<8x128xf32>
      %73 = arith.addf %70, %72 : vector<8x128xf32>
      %cst_41 = arith.constant -5.000000e-01 : f32
      %74 = vector.broadcast %cst_41 : f32 to vector<8x128xf32>
      %75 = arith.mulf %74, %60 : vector<8x128xf32>
      %76 = arith.addf %73, %75 : vector<8x128xf32>
      %c1_i32_42 = arith.constant 1 : i32
      %77 = arith.addi %29, %c1_i32_42 : i32
      %78 = arith.index_cast %77 : i32 to index
      %c0_43 = arith.constant 0 : index
      %79 = vector.load %arg5[%78, %c0_43] : memref<34x128xf32, #tpu.memory_space<vmem>>, vector<8x128xf32>
      tpu.vector_store %arg5[%78, %c0_43], %68 {strides = array<i32>} : memref<34x128xf32, #tpu.memory_space<vmem>>, vector<8x128xf32>,
      %80 = arith.index_cast %77 : i32 to index
      %c0_44 = arith.constant 0 : index
      %81 = vector.load %arg6[%80, %c0_44] : memref<34x128xf32, #tpu.memory_space<vmem>>, vector<8x128xf32>
      tpu.vector_store %arg6[%80, %c0_44], %76 {strides = array<i32>} : memref<34x128xf32, #tpu.memory_space<vmem>>, vector<8x128xf32>,
      %cst_45 = arith.constant 1.000000e+00 : f32
      %82 = vector.broadcast %cst_45 : f32 to vector<8x128xf32>
      %83 = arith.mulf %82, %35 : vector<8x128xf32>
      %cst_46 = arith.constant 0.000000e+00 : f32
      %84 = vector.broadcast %cst_46 : f32 to vector<8x128xf32>
      %85 = arith.mulf %84, %40 : vector<8x128xf32>
      %86 = arith.addf %83, %85 : vector<8x128xf32>
      %cst_47 = arith.constant -1.000000e+00 : f32
      %87 = vector.broadcast %cst_47 : f32 to vector<8x128xf32>
      %88 = arith.mulf %87, %45 : vector<8x128xf32>
      %89 = arith.addf %86, %88 : vector<8x128xf32>
      %90 = arith.index_cast %77 : i32 to index
      %c0_48 = arith.constant 0 : index
      %91 = vector.load %arg7[%90, %c0_48] : memref<34x128xf32, #tpu.memory_space<vmem>>, vector<8x128xf32>
      tpu.vector_store %arg7[%90, %c0_48], %89 {strides = array<i32>} : memref<34x128xf32, #tpu.memory_space<vmem>>, vector<8x128xf32>,
      %cst_49 = arith.constant -5.000000e-01 : f32
      %92 = vector.broadcast %cst_49 : f32 to vector<8x128xf32>
      %93 = arith.mulf %92, %35 : vector<8x128xf32>
      %cst_50 = arith.constant 1.000000e+00 : f32
      %94 = vector.broadcast %cst_50 : f32 to vector<8x128xf32>
      %95 = arith.mulf %94, %40 : vector<8x128xf32>
      %96 = arith.addf %93, %95 : vector<8x128xf32>
      %cst_51 = arith.constant -5.000000e-01 : f32
      %97 = vector.broadcast %cst_51 : f32 to vector<8x128xf32>
      %98 = arith.mulf %97, %45 : vector<8x128xf32>
      %99 = arith.addf %96, %98 : vector<8x128xf32>
      %100 = arith.index_cast %77 : i32 to index
      %c0_52 = arith.constant 0 : index
      %101 = vector.load %arg8[%100, %c0_52] : memref<34x128xf32, #tpu.memory_space<vmem>>, vector<8x128xf32>
      tpu.vector_store %arg8[%100, %c0_52], %99 {strides = array<i32>} : memref<34x128xf32, #tpu.memory_space<vmem>>, vector<8x128xf32>,
      %cst_53 = arith.constant 6.666600e-01 : f32
      %102 = vector.broadcast %cst_53 : f32 to vector<8x128xf32>
      %103 = arith.mulf %102, %35 : vector<8x128xf32>
      %cst_54 = arith.constant 6.666600e-01 : f32
      %104 = vector.broadcast %cst_54 : f32 to vector<8x128xf32>
      %105 = arith.mulf %104, %40 : vector<8x128xf32>
      %106 = arith.addf %103, %105 : vector<8x128xf32>
      %cst_55 = arith.constant 6.666600e-01 : f32
      %107 = vector.broadcast %cst_55 : f32 to vector<8x128xf32>
      %108 = arith.mulf %107, %45 : vector<8x128xf32>
      %109 = arith.addf %106, %108 : vector<8x128xf32>
      %110 = arith.index_cast %29 : i32 to index
      %c0_56 = arith.constant 0 : index
      %111 = vector.load %arg9[%110, %c0_56] : memref<32x128xf32, #tpu.memory_space<vmem>>, vector<8x128xf32>
      tpu.vector_store %arg9[%110, %c0_56], %109 {strides = array<i32>} : memref<32x128xf32, #tpu.memory_space<vmem>>, vector<8x128xf32>,
    }
    %c4_i32_0 = arith.constant 4 : i32
    %cst = arith.constant 0.000000e+00 : f32
    %2 = vector.broadcast %cst : f32 to vector<1x128xf32>
    %c0_i32_1 = arith.constant 0 : i32
    %3 = arith.cmpi eq, %arg1, %c0_i32_1 : i32
    %4 = arith.extui %3 : i1 to i32
    %c0_i32_2 = arith.constant 0 : i32
    %5 = arith.cmpi ne, %4, %c0_i32_2 : i32
    scf.if %5 {
      %c0 = arith.constant 0 : index
      %c0_15 = arith.constant 0 : index
      %28 = vector.load %arg5[%c0, %c0_15] : memref<34x128xf32, #tpu.memory_space<vmem>>, vector<1x128xf32>
      tpu.vector_store %arg5[%c0, %c0_15], %2 {strides = array<i32>} : memref<34x128xf32, #tpu.memory_space<vmem>>, vector<1x128xf32>,
      %c0_16 = arith.constant 0 : index
      %c0_17 = arith.constant 0 : index
      %29 = vector.load %arg6[%c0_16, %c0_17] : memref<34x128xf32, #tpu.memory_space<vmem>>, vector<1x128xf32>
      tpu.vector_store %arg6[%c0_16, %c0_17], %2 {strides = array<i32>} : memref<34x128xf32, #tpu.memory_space<vmem>>, vector<1x128xf32>,
      %c0_18 = arith.constant 0 : index
      %c0_19 = arith.constant 0 : index
      %30 = vector.load %arg7[%c0_18, %c0_19] : memref<34x128xf32, #tpu.memory_space<vmem>>, vector<1x128xf32>
      tpu.vector_store %arg7[%c0_18, %c0_19], %2 {strides = array<i32>} : memref<34x128xf32, #tpu.memory_space<vmem>>, vector<1x128xf32>,
      %c0_20 = arith.constant 0 : index
      %c0_21 = arith.constant 0 : index
      %31 = vector.load %arg8[%c0_20, %c0_21] : memref<34x128xf32, #tpu.memory_space<vmem>>, vector<1x128xf32>
      tpu.vector_store %arg8[%c0_20, %c0_21], %2 {strides = array<i32>} : memref<34x128xf32, #tpu.memory_space<vmem>>, vector<1x128xf32>,
    } else {
    }
    %c0_i32_3 = arith.constant 0 : i32
    %6 = arith.cmpi sgt, %arg1, %c0_i32_3 : i32
    %7 = arith.extui %6 : i1 to i32
    %c0_i32_4 = arith.constant 0 : i32
    %8 = arith.cmpi ne, %7, %c0_i32_4 : i32
    scf.if %8 {
      %c1_i32_15 = arith.constant 1 : i32
      %28 = arith.subi %0, %c1_i32_15 : i32
      %c0 = arith.constant 0 : index
      %c0_16 = arith.constant 0 : index
      %29 = arith.index_cast %28 : i32 to index
      %c0_17 = arith.constant 0 : index
      %30 = vector.load %arg2[%c0, %c0_16, %29, %c0_17] : memref<1x3x64x128xf32, #tpu.memory_space<vmem>>, vector<1x1x1x128xf32>
      %31 = vector.shape_cast %30 : vector<1x1x1x128xf32> to vector<1x128xf32>
      %cst_18 = arith.constant 5.000000e-01 : f32
      %32 = vector.broadcast %cst_18 : f32 to vector<1x128xf32>
      %33 = arith.subf %31, %32 : vector<1x128xf32>
      %c0_19 = arith.constant 0 : index
      %c1 = arith.constant 1 : index
      %34 = arith.index_cast %28 : i32 to index
      %c0_20 = arith.constant 0 : index
      %35 = vector.load %arg2[%c0_19, %c1, %34, %c0_20] : memref<1x3x64x128xf32, #tpu.memory_space<vmem>>, vector<1x1x1x128xf32>
      %36 = vector.shape_cast %35 : vector<1x1x1x128xf32> to vector<1x128xf32>
      %cst_21 = arith.constant 5.000000e-01 : f32
      %37 = vector.broadcast %cst_21 : f32 to vector<1x128xf32>
      %38 = arith.subf %36, %37 : vector<1x128xf32>
      %c0_22 = arith.constant 0 : index
      %c2 = arith.constant 2 : index
      %39 = arith.index_cast %28 : i32 to index
      %c0_23 = arith.constant 0 : index
      %40 = vector.load %arg2[%c0_22, %c2, %39, %c0_23] : memref<1x3x64x128xf32, #tpu.memory_space<vmem>>, vector<1x1x1x128xf32>
      %41 = vector.shape_cast %40 : vector<1x1x1x128xf32> to vector<1x128xf32>
      %cst_24 = arith.constant 5.000000e-01 : f32
      %42 = vector.broadcast %cst_24 : f32 to vector<1x128xf32>
      %43 = arith.subf %41, %42 : vector<1x128xf32>
      %cst_25 = arith.constant 1.000000e+00 : f32
      %44 = vector.broadcast %cst_25 : f32 to vector<1x128xf32>
      %45 = arith.mulf %44, %33 : vector<1x128xf32>
      %cst_26 = arith.constant 0.000000e+00 : f32
      %46 = vector.broadcast %cst_26 : f32 to vector<1x128xf32>
      %47 = arith.mulf %46, %38 : vector<1x128xf32>
      %48 = arith.addf %45, %47 : vector<1x128xf32>
      %cst_27 = arith.constant -1.000000e+00 : f32
      %49 = vector.broadcast %cst_27 : f32 to vector<1x128xf32>
      %50 = arith.mulf %49, %43 : vector<1x128xf32>
      %51 = arith.addf %48, %50 : vector<1x128xf32>
      %cst_28 = arith.constant -5.000000e-01 : f32
      %52 = vector.broadcast %cst_28 : f32 to vector<1x128xf32>
      %53 = arith.mulf %52, %33 : vector<1x128xf32>
      %cst_29 = arith.constant 1.000000e+00 : f32
      %54 = vector.broadcast %cst_29 : f32 to vector<1x128xf32>
      %55 = arith.mulf %54, %38 : vector<1x128xf32>
      %56 = arith.addf %53, %55 : vector<1x128xf32>
      %cst_30 = arith.constant -5.000000e-01 : f32
      %57 = vector.broadcast %cst_30 : f32 to vector<1x128xf32>
      %58 = arith.mulf %57, %43 : vector<1x128xf32>
      %59 = arith.addf %56, %58 : vector<1x128xf32>
      %c0_31 = arith.constant 0 : index
      %c0_32 = arith.constant 0 : index
      %60 = arith.index_cast %28 : i32 to index
      %c0_33 = arith.constant 0 : index
      %61 = vector.load %arg3[%c0_31, %c0_32, %60, %c0_33] : memref<1x3x64x128xf32, #tpu.memory_space<vmem>>, vector<1x1x1x128xf32>
      %62 = vector.shape_cast %61 : vector<1x1x1x128xf32> to vector<1x128xf32>
      %cst_34 = arith.constant 5.000000e-01 : f32
      %63 = vector.broadcast %cst_34 : f32 to vector<1x128xf32>
      %64 = arith.subf %62, %63 : vector<1x128xf32>
      %c0_35 = arith.constant 0 : index
      %c1_36 = arith.constant 1 : index
      %65 = arith.index_cast %28 : i32 to index
      %c0_37 = arith.constant 0 : index
      %66 = vector.load %arg3[%c0_35, %c1_36, %65, %c0_37] : memref<1x3x64x128xf32, #tpu.memory_space<vmem>>, vector<1x1x1x128xf32>
      %67 = vector.shape_cast %66 : vector<1x1x1x128xf32> to vector<1x128xf32>
      %cst_38 = arith.constant 5.000000e-01 : f32
      %68 = vector.broadcast %cst_38 : f32 to vector<1x128xf32>
      %69 = arith.subf %67, %68 : vector<1x128xf32>
      %c0_39 = arith.constant 0 : index
      %c2_40 = arith.constant 2 : index
      %70 = arith.index_cast %28 : i32 to index
      %c0_41 = arith.constant 0 : index
      %71 = vector.load %arg3[%c0_39, %c2_40, %70, %c0_41] : memref<1x3x64x128xf32, #tpu.memory_space<vmem>>, vector<1x1x1x128xf32>
      %72 = vector.shape_cast %71 : vector<1x1x1x128xf32> to vector<1x128xf32>
      %cst_42 = arith.constant 5.000000e-01 : f32
      %73 = vector.broadcast %cst_42 : f32 to vector<1x128xf32>
      %74 = arith.subf %72, %73 : vector<1x128xf32>
      %cst_43 = arith.constant 1.000000e+00 : f32
      %75 = vector.broadcast %cst_43 : f32 to vector<1x128xf32>
      %76 = arith.mulf %75, %64 : vector<1x128xf32>
      %cst_44 = arith.constant 0.000000e+00 : f32
      %77 = vector.broadcast %cst_44 : f32 to vector<1x128xf32>
      %78 = arith.mulf %77, %69 : vector<1x128xf32>
      %79 = arith.addf %76, %78 : vector<1x128xf32>
      %cst_45 = arith.constant -1.000000e+00 : f32
      %80 = vector.broadcast %cst_45 : f32 to vector<1x128xf32>
      %81 = arith.mulf %80, %74 : vector<1x128xf32>
      %82 = arith.addf %79, %81 : vector<1x128xf32>
      %cst_46 = arith.constant -5.000000e-01 : f32
      %83 = vector.broadcast %cst_46 : f32 to vector<1x128xf32>
      %84 = arith.mulf %83, %64 : vector<1x128xf32>
      %cst_47 = arith.constant 1.000000e+00 : f32
      %85 = vector.broadcast %cst_47 : f32 to vector<1x128xf32>
      %86 = arith.mulf %85, %69 : vector<1x128xf32>
      %87 = arith.addf %84, %86 : vector<1x128xf32>
      %cst_48 = arith.constant -5.000000e-01 : f32
      %88 = vector.broadcast %cst_48 : f32 to vector<1x128xf32>
      %89 = arith.mulf %88, %74 : vector<1x128xf32>
      %90 = arith.addf %87, %89 : vector<1x128xf32>
      %c0_49 = arith.constant 0 : index
      %c0_50 = arith.constant 0 : index
      %91 = vector.load %arg5[%c0_49, %c0_50] : memref<34x128xf32, #tpu.memory_space<vmem>>, vector<1x128xf32>
      tpu.vector_store %arg5[%c0_49, %c0_50], %51 {strides = array<i32>} : memref<34x128xf32, #tpu.memory_space<vmem>>, vector<1x128xf32>,
      %c0_51 = arith.constant 0 : index
      %c0_52 = arith.constant 0 : index
      %92 = vector.load %arg6[%c0_51, %c0_52] : memref<34x128xf32, #tpu.memory_space<vmem>>, vector<1x128xf32>
      tpu.vector_store %arg6[%c0_51, %c0_52], %59 {strides = array<i32>} : memref<34x128xf32, #tpu.memory_space<vmem>>, vector<1x128xf32>,
      %c0_53 = arith.constant 0 : index
      %c0_54 = arith.constant 0 : index
      %93 = vector.load %arg7[%c0_53, %c0_54] : memref<34x128xf32, #tpu.memory_space<vmem>>, vector<1x128xf32>
      tpu.vector_store %arg7[%c0_53, %c0_54], %82 {strides = array<i32>} : memref<34x128xf32, #tpu.memory_space<vmem>>, vector<1x128xf32>,
      %c0_55 = arith.constant 0 : index
      %c0_56 = arith.constant 0 : index
      %94 = vector.load %arg8[%c0_55, %c0_56] : memref<34x128xf32, #tpu.memory_space<vmem>>, vector<1x128xf32>
      tpu.vector_store %arg8[%c0_55, %c0_56], %90 {strides = array<i32>} : memref<34x128xf32, #tpu.memory_space<vmem>>, vector<1x128xf32>,
    } else {
    }
    %c1_i32_5 = arith.constant 1 : i32
    %9 = arith.cmpi eq, %arg1, %c1_i32_5 : i32
    %10 = arith.extui %9 : i1 to i32
    %c0_i32_6 = arith.constant 0 : i32
    %11 = arith.cmpi ne, %10, %c0_i32_6 : i32
    scf.if %11 {
      %c33 = arith.constant 33 : index
      %c0 = arith.constant 0 : index
      %28 = vector.load %arg5[%c33, %c0] : memref<34x128xf32, #tpu.memory_space<vmem>>, vector<1x128xf32>
      tpu.vector_store %arg5[%c33, %c0], %2 {strides = array<i32>} : memref<34x128xf32, #tpu.memory_space<vmem>>, vector<1x128xf32>,
      %c33_15 = arith.constant 33 : index
      %c0_16 = arith.constant 0 : index
      %29 = vector.load %arg6[%c33_15, %c0_16] : memref<34x128xf32, #tpu.memory_space<vmem>>, vector<1x128xf32>
      tpu.vector_store %arg6[%c33_15, %c0_16], %2 {strides = array<i32>} : memref<34x128xf32, #tpu.memory_space<vmem>>, vector<1x128xf32>,
      %c33_17 = arith.constant 33 : index
      %c0_18 = arith.constant 0 : index
      %30 = vector.load %arg7[%c33_17, %c0_18] : memref<34x128xf32, #tpu.memory_space<vmem>>, vector<1x128xf32>
      tpu.vector_store %arg7[%c33_17, %c0_18], %2 {strides = array<i32>} : memref<34x128xf32, #tpu.memory_space<vmem>>, vector<1x128xf32>,
      %c33_19 = arith.constant 33 : index
      %c0_20 = arith.constant 0 : index
      %31 = vector.load %arg8[%c33_19, %c0_20] : memref<34x128xf32, #tpu.memory_space<vmem>>, vector<1x128xf32>
      tpu.vector_store %arg8[%c33_19, %c0_20], %2 {strides = array<i32>} : memref<34x128xf32, #tpu.memory_space<vmem>>, vector<1x128xf32>,
    } else {
    }
    %c1_i32_7 = arith.constant 1 : i32
    %12 = arith.cmpi slt, %arg1, %c1_i32_7 : i32
    %13 = arith.extui %12 : i1 to i32
    %c0_i32_8 = arith.constant 0 : i32
    %14 = arith.cmpi ne, %13, %c0_i32_8 : i32
    scf.if %14 {
      %c32_i32_15 = arith.constant 32 : i32
      %28 = arith.addi %0, %c32_i32_15 : i32
      %c0 = arith.constant 0 : index
      %c0_16 = arith.constant 0 : index
      %29 = arith.index_cast %28 : i32 to index
      %c0_17 = arith.constant 0 : index
      %30 = vector.load %arg2[%c0, %c0_16, %29, %c0_17] : memref<1x3x64x128xf32, #tpu.memory_space<vmem>>, vector<1x1x1x128xf32>
      %31 = vector.shape_cast %30 : vector<1x1x1x128xf32> to vector<1x128xf32>
      %cst_18 = arith.constant 5.000000e-01 : f32
      %32 = vector.broadcast %cst_18 : f32 to vector<1x128xf32>
      %33 = arith.subf %31, %32 : vector<1x128xf32>
      %c0_19 = arith.constant 0 : index
      %c1 = arith.constant 1 : index
      %34 = arith.index_cast %28 : i32 to index
      %c0_20 = arith.constant 0 : index
      %35 = vector.load %arg2[%c0_19, %c1, %34, %c0_20] : memref<1x3x64x128xf32, #tpu.memory_space<vmem>>, vector<1x1x1x128xf32>
      %36 = vector.shape_cast %35 : vector<1x1x1x128xf32> to vector<1x128xf32>
      %cst_21 = arith.constant 5.000000e-01 : f32
      %37 = vector.broadcast %cst_21 : f32 to vector<1x128xf32>
      %38 = arith.subf %36, %37 : vector<1x128xf32>
      %c0_22 = arith.constant 0 : index
      %c2 = arith.constant 2 : index
      %39 = arith.index_cast %28 : i32 to index
      %c0_23 = arith.constant 0 : index
      %40 = vector.load %arg2[%c0_22, %c2, %39, %c0_23] : memref<1x3x64x128xf32, #tpu.memory_space<vmem>>, vector<1x1x1x128xf32>
      %41 = vector.shape_cast %40 : vector<1x1x1x128xf32> to vector<1x128xf32>
      %cst_24 = arith.constant 5.000000e-01 : f32
      %42 = vector.broadcast %cst_24 : f32 to vector<1x128xf32>
      %43 = arith.subf %41, %42 : vector<1x128xf32>
      %cst_25 = arith.constant 1.000000e+00 : f32
      %44 = vector.broadcast %cst_25 : f32 to vector<1x128xf32>
      %45 = arith.mulf %44, %33 : vector<1x128xf32>
      %cst_26 = arith.constant 0.000000e+00 : f32
      %46 = vector.broadcast %cst_26 : f32 to vector<1x128xf32>
      %47 = arith.mulf %46, %38 : vector<1x128xf32>
      %48 = arith.addf %45, %47 : vector<1x128xf32>
      %cst_27 = arith.constant -1.000000e+00 : f32
      %49 = vector.broadcast %cst_27 : f32 to vector<1x128xf32>
      %50 = arith.mulf %49, %43 : vector<1x128xf32>
      %51 = arith.addf %48, %50 : vector<1x128xf32>
      %cst_28 = arith.constant -5.000000e-01 : f32
      %52 = vector.broadcast %cst_28 : f32 to vector<1x128xf32>
      %53 = arith.mulf %52, %33 : vector<1x128xf32>
      %cst_29 = arith.constant 1.000000e+00 : f32
      %54 = vector.broadcast %cst_29 : f32 to vector<1x128xf32>
      %55 = arith.mulf %54, %38 : vector<1x128xf32>
      %56 = arith.addf %53, %55 : vector<1x128xf32>
      %cst_30 = arith.constant -5.000000e-01 : f32
      %57 = vector.broadcast %cst_30 : f32 to vector<1x128xf32>
      %58 = arith.mulf %57, %43 : vector<1x128xf32>
      %59 = arith.addf %56, %58 : vector<1x128xf32>
      %c0_31 = arith.constant 0 : index
      %c0_32 = arith.constant 0 : index
      %60 = arith.index_cast %28 : i32 to index
      %c0_33 = arith.constant 0 : index
      %61 = vector.load %arg3[%c0_31, %c0_32, %60, %c0_33] : memref<1x3x64x128xf32, #tpu.memory_space<vmem>>, vector<1x1x1x128xf32>
      %62 = vector.shape_cast %61 : vector<1x1x1x128xf32> to vector<1x128xf32>
      %cst_34 = arith.constant 5.000000e-01 : f32
      %63 = vector.broadcast %cst_34 : f32 to vector<1x128xf32>
      %64 = arith.subf %62, %63 : vector<1x128xf32>
      %c0_35 = arith.constant 0 : index
      %c1_36 = arith.constant 1 : index
      %65 = arith.index_cast %28 : i32 to index
      %c0_37 = arith.constant 0 : index
      %66 = vector.load %arg3[%c0_35, %c1_36, %65, %c0_37] : memref<1x3x64x128xf32, #tpu.memory_space<vmem>>, vector<1x1x1x128xf32>
      %67 = vector.shape_cast %66 : vector<1x1x1x128xf32> to vector<1x128xf32>
      %cst_38 = arith.constant 5.000000e-01 : f32
      %68 = vector.broadcast %cst_38 : f32 to vector<1x128xf32>
      %69 = arith.subf %67, %68 : vector<1x128xf32>
      %c0_39 = arith.constant 0 : index
      %c2_40 = arith.constant 2 : index
      %70 = arith.index_cast %28 : i32 to index
      %c0_41 = arith.constant 0 : index
      %71 = vector.load %arg3[%c0_39, %c2_40, %70, %c0_41] : memref<1x3x64x128xf32, #tpu.memory_space<vmem>>, vector<1x1x1x128xf32>
      %72 = vector.shape_cast %71 : vector<1x1x1x128xf32> to vector<1x128xf32>
      %cst_42 = arith.constant 5.000000e-01 : f32
      %73 = vector.broadcast %cst_42 : f32 to vector<1x128xf32>
      %74 = arith.subf %72, %73 : vector<1x128xf32>
      %cst_43 = arith.constant 1.000000e+00 : f32
      %75 = vector.broadcast %cst_43 : f32 to vector<1x128xf32>
      %76 = arith.mulf %75, %64 : vector<1x128xf32>
      %cst_44 = arith.constant 0.000000e+00 : f32
      %77 = vector.broadcast %cst_44 : f32 to vector<1x128xf32>
      %78 = arith.mulf %77, %69 : vector<1x128xf32>
      %79 = arith.addf %76, %78 : vector<1x128xf32>
      %cst_45 = arith.constant -1.000000e+00 : f32
      %80 = vector.broadcast %cst_45 : f32 to vector<1x128xf32>
      %81 = arith.mulf %80, %74 : vector<1x128xf32>
      %82 = arith.addf %79, %81 : vector<1x128xf32>
      %cst_46 = arith.constant -5.000000e-01 : f32
      %83 = vector.broadcast %cst_46 : f32 to vector<1x128xf32>
      %84 = arith.mulf %83, %64 : vector<1x128xf32>
      %cst_47 = arith.constant 1.000000e+00 : f32
      %85 = vector.broadcast %cst_47 : f32 to vector<1x128xf32>
      %86 = arith.mulf %85, %69 : vector<1x128xf32>
      %87 = arith.addf %84, %86 : vector<1x128xf32>
      %cst_48 = arith.constant -5.000000e-01 : f32
      %88 = vector.broadcast %cst_48 : f32 to vector<1x128xf32>
      %89 = arith.mulf %88, %74 : vector<1x128xf32>
      %90 = arith.addf %87, %89 : vector<1x128xf32>
      %c33 = arith.constant 33 : index
      %c0_49 = arith.constant 0 : index
      %91 = vector.load %arg5[%c33, %c0_49] : memref<34x128xf32, #tpu.memory_space<vmem>>, vector<1x128xf32>
      tpu.vector_store %arg5[%c33, %c0_49], %51 {strides = array<i32>} : memref<34x128xf32, #tpu.memory_space<vmem>>, vector<1x128xf32>,
      %c33_50 = arith.constant 33 : index
      %c0_51 = arith.constant 0 : index
      %92 = vector.load %arg6[%c33_50, %c0_51] : memref<34x128xf32, #tpu.memory_space<vmem>>, vector<1x128xf32>
      tpu.vector_store %arg6[%c33_50, %c0_51], %59 {strides = array<i32>} : memref<34x128xf32, #tpu.memory_space<vmem>>, vector<1x128xf32>,
      %c33_52 = arith.constant 33 : index
      %c0_53 = arith.constant 0 : index
      %93 = vector.load %arg7[%c33_52, %c0_53] : memref<34x128xf32, #tpu.memory_space<vmem>>, vector<1x128xf32>
      tpu.vector_store %arg7[%c33_52, %c0_53], %82 {strides = array<i32>} : memref<34x128xf32, #tpu.memory_space<vmem>>, vector<1x128xf32>,
      %c33_54 = arith.constant 33 : index
      %c0_55 = arith.constant 0 : index
      %94 = vector.load %arg8[%c33_54, %c0_55] : memref<34x128xf32, #tpu.memory_space<vmem>>, vector<1x128xf32>
      tpu.vector_store %arg8[%c33_54, %c0_55], %90 {strides = array<i32>} : memref<34x128xf32, #tpu.memory_space<vmem>>, vector<1x128xf32>,
    } else {
    }
    %15 = tpu.iota {dimensions = array<i32: 1>} : vector<8x128xi32>
    %c1_i32_9 = arith.constant 1 : i32
    %16 = vector.broadcast %c1_i32_9 : i32 to vector<8x128xi32>
    %17 = arith.cmpi sge, %15, %16 : vector<8x128xi32>
    %c129_i32 = arith.constant 129 : i32
    %18 = vector.broadcast %c129_i32 : i32 to vector<8x128xi32>
    %19 = arith.cmpi slt, %15, %18 : vector<8x128xi32>
    %20 = arith.andi %17, %19 : vector<8x128xi1>
    %c-1_i32 = arith.constant -1 : i32
    %21 = vector.broadcast %c-1_i32 : i32 to vector<8x128xi32>
    %22 = arith.cmpi sge, %15, %21 : vector<8x128xi32>
    %c127_i32 = arith.constant 127 : i32
    %23 = vector.broadcast %c127_i32 : i32 to vector<8x128xi32>
    %24 = arith.cmpi slt, %15, %23 : vector<8x128xi32>
    %25 = arith.andi %22, %24 : vector<8x128xi1>
    %cst_10 = arith.constant 1.000000e+00 : f32
    %26 = vector.broadcast %cst_10 : f32 to vector<8x128xf32>
    %c0_i32_11 = arith.constant 0 : i32
    %c4_i32_12 = arith.constant 4 : i32
    %27 = arith.addi %c0_i32_11, %c4_i32_12 : i32
    %c1_i32_13 = arith.constant 1 : i32
    scf.for %arg10 = %c0_i32_11 to %27 step %c1_i32_13  : i32 {
      %c8_i32 = arith.constant 8 : i32
      %28 = arith.muli %arg10, %c8_i32 : i32
      %29 = tpu.assume_multiple %28, 8 : i32
      %c1_i32_15 = arith.constant 1 : i32
      %30 = arith.addi %29, %c1_i32_15 : i32
      %31 = arith.index_cast %30 : i32 to index
      %c0 = arith.constant 0 : index
      %32 = vector.load %arg5[%31, %c0] : memref<34x128xf32, #tpu.memory_space<vmem>>, vector<8x128xf32>
      %33 = arith.index_cast %30 : i32 to index
      %c0_16 = arith.constant 0 : index
      %34 = vector.load %arg6[%33, %c0_16] : memref<34x128xf32, #tpu.memory_space<vmem>>, vector<8x128xf32>
      %35 = arith.index_cast %30 : i32 to index
      %c0_17 = arith.constant 0 : index
      %36 = vector.load %arg7[%35, %c0_17] : memref<34x128xf32, #tpu.memory_space<vmem>>, vector<8x128xf32>
      %37 = arith.index_cast %30 : i32 to index
      %c0_18 = arith.constant 0 : index
      %38 = vector.load %arg8[%37, %c0_18] : memref<34x128xf32, #tpu.memory_space<vmem>>, vector<8x128xf32>
      %39 = arith.mulf %32, %32 : vector<8x128xf32>
      %40 = arith.mulf %34, %34 : vector<8x128xf32>
      %41 = arith.addf %39, %40 : vector<8x128xf32>
      %c0_i32_19 = arith.constant 0 : i32
      %42 = arith.addi %29, %c0_i32_19 : i32
      %43 = arith.index_cast %42 : i32 to index
      %c0_20 = arith.constant 0 : index
      %44 = vector.load %arg5[%43, %c0_20] : memref<34x128xf32, #tpu.memory_space<vmem>>, vector<8x128xf32>
      %45 = arith.index_cast %42 : i32 to index
      %c0_21 = arith.constant 0 : index
      %46 = vector.load %arg6[%45, %c0_21] : memref<34x128xf32, #tpu.memory_space<vmem>>, vector<8x128xf32>
      %47 = arith.index_cast %42 : i32 to index
      %c0_22 = arith.constant 0 : index
      %48 = vector.load %arg7[%47, %c0_22] : memref<34x128xf32, #tpu.memory_space<vmem>>, vector<8x128xf32>
      %49 = arith.index_cast %42 : i32 to index
      %c0_23 = arith.constant 0 : index
      %50 = vector.load %arg8[%49, %c0_23] : memref<34x128xf32, #tpu.memory_space<vmem>>, vector<8x128xf32>
      %c1_i32_24 = arith.constant 1 : i32
      %51 = tpu.dynamic_rotate %44 by %c1_i32_24 dim 1 : vector<8x128xf32>, i32 -> vector<8x128xf32>
      %c1_i32_25 = arith.constant 1 : i32
      %52 = tpu.dynamic_rotate %46 by %c1_i32_25 dim 1 : vector<8x128xf32>, i32 -> vector<8x128xf32>
      %c1_i32_26 = arith.constant 1 : i32
      %53 = tpu.dynamic_rotate %48 by %c1_i32_26 dim 1 : vector<8x128xf32>, i32 -> vector<8x128xf32>
      %c1_i32_27 = arith.constant 1 : i32
      %54 = tpu.dynamic_rotate %50 by %c1_i32_27 dim 1 : vector<8x128xf32>, i32 -> vector<8x128xf32>
      %55 = arith.subf %51, %32 : vector<8x128xf32>
      %56 = arith.mulf %55, %55 : vector<8x128xf32>
      %57 = arith.subf %52, %34 : vector<8x128xf32>
      %58 = arith.mulf %57, %57 : vector<8x128xf32>
      %59 = arith.addf %56, %58 : vector<8x128xf32>
      %60 = arith.select %20, %59, %41 : vector<8x128xi1>, vector<8x128xf32>
      %cst_28 = arith.constant -1.000000e+00 : f32
      %61 = vector.broadcast %cst_28 : f32 to vector<8x128xf32>
      %62 = arith.mulf %60, %61 : vector<8x128xf32>
      %63 = math.exp %62 : vector<8x128xf32>
      %64 = arith.addf %26, %63 : vector<8x128xf32>
      %cst_29 = arith.constant 0.000000e+00 : f32
      %65 = vector.broadcast %cst_29 : f32 to vector<8x128xf32>
      %66 = arith.select %20, %63, %65 : vector<8x128xi1>, vector<8x128xf32>
      %67 = arith.mulf %66, %53 : vector<8x128xf32>
      %68 = arith.addf %36, %67 : vector<8x128xf32>
      %69 = arith.mulf %66, %54 : vector<8x128xf32>
      %70 = arith.addf %38, %69 : vector<8x128xf32>
      %71 = arith.subf %44, %32 : vector<8x128xf32>
      %72 = arith.mulf %71, %71 : vector<8x128xf32>
      %73 = arith.subf %46, %34 : vector<8x128xf32>
      %74 = arith.mulf %73, %73 : vector<8x128xf32>
      %75 = arith.addf %72, %74 : vector<8x128xf32>
      %cst_30 = arith.constant -1.000000e+00 : f32
      %76 = vector.broadcast %cst_30 : f32 to vector<8x128xf32>
      %77 = arith.mulf %75, %76 : vector<8x128xf32>
      %78 = math.exp %77 : vector<8x128xf32>
      %79 = arith.addf %64, %78 : vector<8x128xf32>
      %80 = arith.mulf %78, %48 : vector<8x128xf32>
      %81 = arith.addf %68, %80 : vector<8x128xf32>
      %82 = arith.mulf %78, %50 : vector<8x128xf32>
      %83 = arith.addf %70, %82 : vector<8x128xf32>
      %c127_i32_31 = arith.constant 127 : i32
      %84 = tpu.dynamic_rotate %44 by %c127_i32_31 dim 1 : vector<8x128xf32>, i32 -> vector<8x128xf32>
      %c127_i32_32 = arith.constant 127 : i32
      %85 = tpu.dynamic_rotate %46 by %c127_i32_32 dim 1 : vector<8x128xf32>, i32 -> vector<8x128xf32>
      %c127_i32_33 = arith.constant 127 : i32
      %86 = tpu.dynamic_rotate %48 by %c127_i32_33 dim 1 : vector<8x128xf32>, i32 -> vector<8x128xf32>
      %c127_i32_34 = arith.constant 127 : i32
      %87 = tpu.dynamic_rotate %50 by %c127_i32_34 dim 1 : vector<8x128xf32>, i32 -> vector<8x128xf32>
      %88 = arith.subf %84, %32 : vector<8x128xf32>
      %89 = arith.mulf %88, %88 : vector<8x128xf32>
      %90 = arith.subf %85, %34 : vector<8x128xf32>
      %91 = arith.mulf %90, %90 : vector<8x128xf32>
      %92 = arith.addf %89, %91 : vector<8x128xf32>
      %93 = arith.select %25, %92, %41 : vector<8x128xi1>, vector<8x128xf32>
      %cst_35 = arith.constant -1.000000e+00 : f32
      %94 = vector.broadcast %cst_35 : f32 to vector<8x128xf32>
      %95 = arith.mulf %93, %94 : vector<8x128xf32>
      %96 = math.exp %95 : vector<8x128xf32>
      %97 = arith.addf %79, %96 : vector<8x128xf32>
      %cst_36 = arith.constant 0.000000e+00 : f32
      %98 = vector.broadcast %cst_36 : f32 to vector<8x128xf32>
      %99 = arith.select %25, %96, %98 : vector<8x128xi1>, vector<8x128xf32>
      %100 = arith.mulf %99, %86 : vector<8x128xf32>
      %101 = arith.addf %81, %100 : vector<8x128xf32>
      %102 = arith.mulf %99, %87 : vector<8x128xf32>
      %103 = arith.addf %83, %102 : vector<8x128xf32>
      %c1_i32_37 = arith.constant 1 : i32
      %104 = tpu.dynamic_rotate %32 by %c1_i32_37 dim 1 : vector<8x128xf32>, i32 -> vector<8x128xf32>
      %c1_i32_38 = arith.constant 1 : i32
      %105 = tpu.dynamic_rotate %34 by %c1_i32_38 dim 1 : vector<8x128xf32>, i32 -> vector<8x128xf32>
      %c1_i32_39 = arith.constant 1 : i32
      %106 = tpu.dynamic_rotate %36 by %c1_i32_39 dim 1 : vector<8x128xf32>, i32 -> vector<8x128xf32>
      %c1_i32_40 = arith.constant 1 : i32
      %107 = tpu.dynamic_rotate %38 by %c1_i32_40 dim 1 : vector<8x128xf32>, i32 -> vector<8x128xf32>
      %108 = arith.subf %104, %32 : vector<8x128xf32>
      %109 = arith.mulf %108, %108 : vector<8x128xf32>
      %110 = arith.subf %105, %34 : vector<8x128xf32>
      %111 = arith.mulf %110, %110 : vector<8x128xf32>
      %112 = arith.addf %109, %111 : vector<8x128xf32>
      %113 = arith.select %20, %112, %41 : vector<8x128xi1>, vector<8x128xf32>
      %cst_41 = arith.constant -1.000000e+00 : f32
      %114 = vector.broadcast %cst_41 : f32 to vector<8x128xf32>
      %115 = arith.mulf %113, %114 : vector<8x128xf32>
      %116 = math.exp %115 : vector<8x128xf32>
      %117 = arith.addf %97, %116 : vector<8x128xf32>
      %cst_42 = arith.constant 0.000000e+00 : f32
      %118 = vector.broadcast %cst_42 : f32 to vector<8x128xf32>
      %119 = arith.select %20, %116, %118 : vector<8x128xi1>, vector<8x128xf32>
      %120 = arith.mulf %119, %106 : vector<8x128xf32>
      %121 = arith.addf %101, %120 : vector<8x128xf32>
      %122 = arith.mulf %119, %107 : vector<8x128xf32>
      %123 = arith.addf %103, %122 : vector<8x128xf32>
      %c127_i32_43 = arith.constant 127 : i32
      %124 = tpu.dynamic_rotate %32 by %c127_i32_43 dim 1 : vector<8x128xf32>, i32 -> vector<8x128xf32>
      %c127_i32_44 = arith.constant 127 : i32
      %125 = tpu.dynamic_rotate %34 by %c127_i32_44 dim 1 : vector<8x128xf32>, i32 -> vector<8x128xf32>
      %c127_i32_45 = arith.constant 127 : i32
      %126 = tpu.dynamic_rotate %36 by %c127_i32_45 dim 1 : vector<8x128xf32>, i32 -> vector<8x128xf32>
      %c127_i32_46 = arith.constant 127 : i32
      %127 = tpu.dynamic_rotate %38 by %c127_i32_46 dim 1 : vector<8x128xf32>, i32 -> vector<8x128xf32>
      %128 = arith.subf %124, %32 : vector<8x128xf32>
      %129 = arith.mulf %128, %128 : vector<8x128xf32>
      %130 = arith.subf %125, %34 : vector<8x128xf32>
      %131 = arith.mulf %130, %130 : vector<8x128xf32>
      %132 = arith.addf %129, %131 : vector<8x128xf32>
      %133 = arith.select %25, %132, %41 : vector<8x128xi1>, vector<8x128xf32>
      %cst_47 = arith.constant -1.000000e+00 : f32
      %134 = vector.broadcast %cst_47 : f32 to vector<8x128xf32>
      %135 = arith.mulf %133, %134 : vector<8x128xf32>
      %136 = math.exp %135 : vector<8x128xf32>
      %137 = arith.addf %117, %136 : vector<8x128xf32>
      %cst_48 = arith.constant 0.000000e+00 : f32
      %138 = vector.broadcast %cst_48 : f32 to vector<8x128xf32>
      %139 = arith.select %25, %136, %138 : vector<8x128xi1>, vector<8x128xf32>
      %140 = arith.mulf %139, %126 : vector<8x128xf32>
      %141 = arith.addf %121, %140 : vector<8x128xf32>
      %142 = arith.mulf %139, %127 : vector<8x128xf32>
      %143 = arith.addf %123, %142 : vector<8x128xf32>
      %c2_i32 = arith.constant 2 : i32
      %144 = arith.addi %29, %c2_i32 : i32
      %145 = arith.index_cast %144 : i32 to index
      %c0_49 = arith.constant 0 : index
      %146 = vector.load %arg5[%145, %c0_49] : memref<34x128xf32, #tpu.memory_space<vmem>>, vector<8x128xf32>
      %147 = arith.index_cast %144 : i32 to index
      %c0_50 = arith.constant 0 : index
      %148 = vector.load %arg6[%147, %c0_50] : memref<34x128xf32, #tpu.memory_space<vmem>>, vector<8x128xf32>
      %149 = arith.index_cast %144 : i32 to index
      %c0_51 = arith.constant 0 : index
      %150 = vector.load %arg7[%149, %c0_51] : memref<34x128xf32, #tpu.memory_space<vmem>>, vector<8x128xf32>
      %151 = arith.index_cast %144 : i32 to index
      %c0_52 = arith.constant 0 : index
      %152 = vector.load %arg8[%151, %c0_52] : memref<34x128xf32, #tpu.memory_space<vmem>>, vector<8x128xf32>
      %c1_i32_53 = arith.constant 1 : i32
      %153 = tpu.dynamic_rotate %146 by %c1_i32_53 dim 1 : vector<8x128xf32>, i32 -> vector<8x128xf32>
      %c1_i32_54 = arith.constant 1 : i32
      %154 = tpu.dynamic_rotate %148 by %c1_i32_54 dim 1 : vector<8x128xf32>, i32 -> vector<8x128xf32>
      %c1_i32_55 = arith.constant 1 : i32
      %155 = tpu.dynamic_rotate %150 by %c1_i32_55 dim 1 : vector<8x128xf32>, i32 -> vector<8x128xf32>
      %c1_i32_56 = arith.constant 1 : i32
      %156 = tpu.dynamic_rotate %152 by %c1_i32_56 dim 1 : vector<8x128xf32>, i32 -> vector<8x128xf32>
      %157 = arith.subf %153, %32 : vector<8x128xf32>
      %158 = arith.mulf %157, %157 : vector<8x128xf32>
      %159 = arith.subf %154, %34 : vector<8x128xf32>
      %160 = arith.mulf %159, %159 : vector<8x128xf32>
      %161 = arith.addf %158, %160 : vector<8x128xf32>
      %162 = arith.select %20, %161, %41 : vector<8x128xi1>, vector<8x128xf32>
      %cst_57 = arith.constant -1.000000e+00 : f32
      %163 = vector.broadcast %cst_57 : f32 to vector<8x128xf32>
      %164 = arith.mulf %162, %163 : vector<8x128xf32>
      %165 = math.exp %164 : vector<8x128xf32>
      %166 = arith.addf %137, %165 : vector<8x128xf32>
      %cst_58 = arith.constant 0.000000e+00 : f32
      %167 = vector.broadcast %cst_58 : f32 to vector<8x128xf32>
      %168 = arith.select %20, %165, %167 : vector<8x128xi1>, vector<8x128xf32>
      %169 = arith.mulf %168, %155 : vector<8x128xf32>
      %170 = arith.addf %141, %169 : vector<8x128xf32>
      %171 = arith.mulf %168, %156 : vector<8x128xf32>
      %172 = arith.addf %143, %171 : vector<8x128xf32>
      %173 = arith.subf %146, %32 : vector<8x128xf32>
      %174 = arith.mulf %173, %173 : vector<8x128xf32>
      %175 = arith.subf %148, %34 : vector<8x128xf32>
      %176 = arith.mulf %175, %175 : vector<8x128xf32>
      %177 = arith.addf %174, %176 : vector<8x128xf32>
      %cst_59 = arith.constant -1.000000e+00 : f32
      %178 = vector.broadcast %cst_59 : f32 to vector<8x128xf32>
      %179 = arith.mulf %177, %178 : vector<8x128xf32>
      %180 = math.exp %179 : vector<8x128xf32>
      %181 = arith.addf %166, %180 : vector<8x128xf32>
      %182 = arith.mulf %180, %150 : vector<8x128xf32>
      %183 = arith.addf %170, %182 : vector<8x128xf32>
      %184 = arith.mulf %180, %152 : vector<8x128xf32>
      %185 = arith.addf %172, %184 : vector<8x128xf32>
      %c127_i32_60 = arith.constant 127 : i32
      %186 = tpu.dynamic_rotate %146 by %c127_i32_60 dim 1 : vector<8x128xf32>, i32 -> vector<8x128xf32>
      %c127_i32_61 = arith.constant 127 : i32
      %187 = tpu.dynamic_rotate %148 by %c127_i32_61 dim 1 : vector<8x128xf32>, i32 -> vector<8x128xf32>
      %c127_i32_62 = arith.constant 127 : i32
      %188 = tpu.dynamic_rotate %150 by %c127_i32_62 dim 1 : vector<8x128xf32>, i32 -> vector<8x128xf32>
      %c127_i32_63 = arith.constant 127 : i32
      %189 = tpu.dynamic_rotate %152 by %c127_i32_63 dim 1 : vector<8x128xf32>, i32 -> vector<8x128xf32>
      %190 = arith.subf %186, %32 : vector<8x128xf32>
      %191 = arith.mulf %190, %190 : vector<8x128xf32>
      %192 = arith.subf %187, %34 : vector<8x128xf32>
      %193 = arith.mulf %192, %192 : vector<8x128xf32>
      %194 = arith.addf %191, %193 : vector<8x128xf32>
      %195 = arith.select %25, %194, %41 : vector<8x128xi1>, vector<8x128xf32>
      %cst_64 = arith.constant -1.000000e+00 : f32
      %196 = vector.broadcast %cst_64 : f32 to vector<8x128xf32>
      %197 = arith.mulf %195, %196 : vector<8x128xf32>
      %198 = math.exp %197 : vector<8x128xf32>
      %199 = arith.addf %181, %198 : vector<8x128xf32>
      %cst_65 = arith.constant 0.000000e+00 : f32
      %200 = vector.broadcast %cst_65 : f32 to vector<8x128xf32>
      %201 = arith.select %25, %198, %200 : vector<8x128xi1>, vector<8x128xf32>
      %202 = arith.mulf %201, %188 : vector<8x128xf32>
      %203 = arith.addf %183, %202 : vector<8x128xf32>
      %204 = arith.mulf %201, %189 : vector<8x128xf32>
      %205 = arith.addf %185, %204 : vector<8x128xf32>
      %cst_66 = arith.constant 1.000000e+00 : f32
      %206 = vector.broadcast %cst_66 : f32 to vector<8x128xf32>
      %207 = arith.divf %206, %199 : vector<8x128xf32>
      %208 = arith.mulf %203, %207 : vector<8x128xf32>
      %209 = arith.mulf %205, %207 : vector<8x128xf32>
      %210 = arith.index_cast %29 : i32 to index
      %c0_67 = arith.constant 0 : index
      %211 = vector.load %arg9[%210, %c0_67] : memref<32x128xf32, #tpu.memory_space<vmem>>, vector<8x128xf32>
      %cst_68 = arith.constant 5.000050e-01 : f32
      %212 = vector.broadcast %cst_68 : f32 to vector<8x128xf32>
      %213 = arith.mulf %212, %211 : vector<8x128xf32>
      %cst_69 = arith.constant 5.000000e-01 : f32
      %214 = vector.broadcast %cst_69 : f32 to vector<8x128xf32>
      %215 = arith.mulf %214, %208 : vector<8x128xf32>
      %216 = arith.addf %213, %215 : vector<8x128xf32>
      %cst_70 = arith.constant -0.333333343 : f32
      %217 = vector.broadcast %cst_70 : f32 to vector<8x128xf32>
      %218 = arith.mulf %217, %209 : vector<8x128xf32>
      %219 = arith.addf %216, %218 : vector<8x128xf32>
      %cst_71 = arith.constant 5.000000e-01 : f32
      %220 = vector.broadcast %cst_71 : f32 to vector<8x128xf32>
      %221 = arith.addf %219, %220 : vector<8x128xf32>
      %c0_72 = arith.constant 0 : index
      %c0_73 = arith.constant 0 : index
      %222 = arith.index_cast %29 : i32 to index
      %c0_74 = arith.constant 0 : index
      %223 = vector.load %arg4[%c0_72, %c0_73, %222, %c0_74] : memref<1x3x32x128xf32, #tpu.memory_space<vmem>>, vector<1x1x8x128xf32>
      %224 = vector.shape_cast %223 : vector<1x1x8x128xf32> to vector<8x128xf32>
      %225 = vector.shape_cast %221 : vector<8x128xf32> to vector<1x1x8x128xf32>
      tpu.vector_store %arg4[%c0_72, %c0_73, %222, %c0_74], %225 {strides = array<i32>} : memref<1x3x32x128xf32, #tpu.memory_space<vmem>>, vector<1x1x8x128xf32>,
      %cst_75 = arith.constant 5.000050e-01 : f32
      %226 = vector.broadcast %cst_75 : f32 to vector<8x128xf32>
      %227 = arith.mulf %226, %211 : vector<8x128xf32>
      %cst_76 = arith.constant -0.000000e+00 : f32
      %228 = vector.broadcast %cst_76 : f32 to vector<8x128xf32>
      %229 = arith.mulf %228, %208 : vector<8x128xf32>
      %230 = arith.addf %227, %229 : vector<8x128xf32>
      %cst_77 = arith.constant 0.666666686 : f32
      %231 = vector.broadcast %cst_77 : f32 to vector<8x128xf32>
      %232 = arith.mulf %231, %209 : vector<8x128xf32>
      %233 = arith.addf %230, %232 : vector<8x128xf32>
      %cst_78 = arith.constant 5.000000e-01 : f32
      %234 = vector.broadcast %cst_78 : f32 to vector<8x128xf32>
      %235 = arith.addf %233, %234 : vector<8x128xf32>
      %c0_79 = arith.constant 0 : index
      %c1 = arith.constant 1 : index
      %236 = arith.index_cast %29 : i32 to index
      %c0_80 = arith.constant 0 : index
      %237 = vector.load %arg4[%c0_79, %c1, %236, %c0_80] : memref<1x3x32x128xf32, #tpu.memory_space<vmem>>, vector<1x1x8x128xf32>
      %238 = vector.shape_cast %237 : vector<1x1x8x128xf32> to vector<8x128xf32>
      %239 = vector.shape_cast %235 : vector<8x128xf32> to vector<1x1x8x128xf32>
      tpu.vector_store %arg4[%c0_79, %c1, %236, %c0_80], %239 {strides = array<i32>} : memref<1x3x32x128xf32, #tpu.memory_space<vmem>>, vector<1x1x8x128xf32>,
      %cst_81 = arith.constant 5.000050e-01 : f32
      %240 = vector.broadcast %cst_81 : f32 to vector<8x128xf32>
      %241 = arith.mulf %240, %211 : vector<8x128xf32>
      %cst_82 = arith.constant -5.000000e-01 : f32
      %242 = vector.broadcast %cst_82 : f32 to vector<8x128xf32>
      %243 = arith.mulf %242, %208 : vector<8x128xf32>
      %244 = arith.addf %241, %243 : vector<8x128xf32>
      %cst_83 = arith.constant -0.333333343 : f32
      %245 = vector.broadcast %cst_83 : f32 to vector<8x128xf32>
      %246 = arith.mulf %245, %209 : vector<8x128xf32>
      %247 = arith.addf %244, %246 : vector<8x128xf32>
      %cst_84 = arith.constant 5.000000e-01 : f32
      %248 = vector.broadcast %cst_84 : f32 to vector<8x128xf32>
      %249 = arith.addf %247, %248 : vector<8x128xf32>
      %c0_85 = arith.constant 0 : index
      %c2 = arith.constant 2 : index
      %250 = arith.index_cast %29 : i32 to index
      %c0_86 = arith.constant 0 : index
      %251 = vector.load %arg4[%c0_85, %c2, %250, %c0_86] : memref<1x3x32x128xf32, #tpu.memory_space<vmem>>, vector<1x1x8x128xf32>
      %252 = vector.shape_cast %251 : vector<1x1x8x128xf32> to vector<8x128xf32>
      %253 = vector.shape_cast %249 : vector<8x128xf32> to vector<1x1x8x128xf32>
      tpu.vector_store %arg4[%c0_85, %c2, %250, %c0_86], %253 {strides = array<i32>} : memref<1x3x32x128xf32, #tpu.memory_space<vmem>>, vector<1x1x8x128xf32>,
    }
    %c4_i32_14 = arith.constant 4 : i32
    return
  }
  func.func @transform_0(%arg0: i32, %arg1: i32) -> (i32, i32, i32, i32) {
    %c0_i32 = arith.constant 0 : i32
    %c0_i32_0 = arith.constant 0 : i32
    %c0_i32_1 = arith.constant 0 : i32
    %c0_i32_2 = arith.constant 0 : i32
    return %arg0, %c0_i32, %c0_i32_0, %c0_i32_1 : i32, i32, i32, i32
  }
  func.func @transform_1(%arg0: i32, %arg1: i32) -> (i32, i32, i32, i32) {
    %c0_i32 = arith.constant 0 : i32
    %c0_i32_0 = arith.constant 0 : i32
    %c0_i32_1 = arith.constant 0 : i32
    %c0_i32_2 = arith.constant 0 : i32
    return %arg0, %c0_i32, %c0_i32_0, %c0_i32_1 : i32, i32, i32, i32
  }
  func.func @transform_2(%arg0: i32, %arg1: i32) -> (i32, i32, i32, i32) {
    %c0_i32 = arith.constant 0 : i32
    %c0_i32_0 = arith.constant 0 : i32
    %c0_i32_1 = arith.constant 0 : i32
    return %arg0, %c0_i32, %arg1, %c0_i32_0 : i32, i32, i32, i32
  }
}

</mosaic_0001>

<bundles_post_ra>
// kernel: tpu_custom_call.1
= control target key start
LH: loop header
LB: loop body
LE: loop exit
PB: predicated region body
PF: predicated region fallthrough
CT: control target
= control target key end

     0   :  { %s1810_s0 = inlined_call_operand.hbm [shape: f32[2,3,64,128], index: 0, kind: input, shape index: {}]   ;;  %s1811_s1 = inlined_call_operand.hbm [shape: f32[2,3,64,128], index: 1, kind: input, shape index: {}]   ;;  %s1812_s2 = inlined_call_operand.hbm [shape: f32[2,3,64,128], index: 2, kind: output, shape index: {}]  }
   0x1   :  { %1820 = sst [smem:[#allocation21_spill]] %s1810_s0 }
   0x2   :  { %7 = vsyncpa [#allocation8], 0 }
   0x3   :  { %9 = vsyncpa [#allocation8 + $0x1], 0 }
   0x4   :  { %10 = vsyncpa [#allocation11], 0 }
   0x5   :  { %12 = vsyncpa [#allocation11 + $0x1], 0 }
   0x6   :  { %13 = vsyncpa [#allocation9], 0 }
   0x7   :  { %15 = vsyncpa [#allocation9 + $0x1], 0  ;;  %s1364_s9 = smov 0   ;;  %s1366_s10 = smov 0  }
   0x8   :  { %s1368_s11 = smov 0   ;;  %s1370_s12 = smov 0  }
   0x9   :  { %s1372_s13 = smov 0   ;;  %s1374_s14 = smov 0  }
   0xa   :  { %s1376_s15 = smov 0   ;;  %s1378_s16 = smov 0  }
   0xb   :  { %s1380_s17 = smov 0   ;;  %s1382_s18 = smov 0  }
   0xc   :  { %s1384_s19 = smov 0  }
   0xd LB: > { %1821 = sst [smem:[#allocation18_spill]] %s1316_s17  ;;  %s898_s20 = sadd.s32 4294967295, %s1324_s19   ;;  %s1324_s19 = sphi %s1384_s19, %s21_s19   ;;  %s1320_s18 = sphi %s1382_s18, %s1847_s18   ;;  %s1316_s17 = sphi %s1380_s17, %s1838_s17   ;;  %s1312_s16 = sphi %s1378_s16, %s1846_s16   ;;  %s1308_s15 = sphi %s1376_s15, %s1837_s15   ;;  %s1304_s14 = sphi %s1374_s14, %s1845_s14   ;;  %s1300_s13 = sphi %s1372_s13, %s1844_s13   ;;  %s1296_s12 = sphi %s1370_s12, %s1843_s12   ;;  %s1292_s11 = sphi %s1368_s11, %s1842_s11   ;;  %s1288_s10 = sphi %s1366_s10, %s1841_s10   ;;  %s1284_s9 = sphi %s1364_s9, %s1840_s9  }
   0xe   : > { %s899_s21 = sadd.s32 4294967294, %s1324_s19   ;;  %s30_s22 = sadd.s32 1, %s1316_s17 }
   0xf   : > { %s33_s23 = sadd.s32 1, %s1320_s18  ;;  %p31_p0 = scmp.ge.s32.totalorder %s30_s22, 2 }
  0x10   : > { %s40_s24 = sadd.s32 1, %s1304_s14  ;;  %p47_p1 = scmp.ne.s32.totalorder %s1304_s14, %s1300_s13 }
  0x11   : > { %p48_p2 = scmp.eq.s32.totalorder %s1324_s19, 0  ;;  %s1849_s22 = smov (%p31_p0, %s30_s22), 0 }
  0x12   : > { %1822 = sst [smem:[#allocation19_spill]] %s1849_s22  ;;  %s1851_s23 = smov (!%p31_p0, %s33_s23), %s1320_s18 }
  0x13   : > { %p1428_p3 = por %p48_p2, %p47_p1  ;;  %p53_p4 = scmp.ne.s32.totalorder %s1300_s13, %s1296_s12 }
  0x14   : > { %p35_p5 = scmp.ge.s32.totalorder %s1851_s23, 2  ;;  %p54_p6 = scmp.eq.s32.totalorder %s898_s20, 0 }
  0x15   : > { %s90_s26 = ssub.s32 %s1316_s17, %s1849_s22  ;;  %s94_s27 = sadd.s32 1, %s1292_s11 }
  0x16   : > { %s1853_s23 = smov (%p35_p5, %s1851_s23), 0  ;;  %p1438_p7 = por %p54_p6, %p53_p4 }
  0x17   : > { %1824 = sst [smem:[#allocation20_spill]] %s1853_s23  ;;  %p104_p8 = scmp.ne.s32.totalorder %s1292_s11, %s1288_s10 }
  0x18   : > { %s1825_s28 = scalar_select %p1438_p7, 1, 0 }
  0x19   : > { %s37_s29 = ssub.s32 %s1320_s18, %s1853_s23  ;;  %p105_p9 = scmp.eq.s32.totalorder %s898_s20, 3 }
  0x1a   : > { %p38_p10 = scmp.eq.s32.totalorder %s37_s29, 0  ;;  %s91_s30 = sor.u32 %s90_s26, %s37_s29 }
  0x1b   : > { %p92_p11 = scmp.eq.s32.totalorder %s91_s30, 0  ;;  %p1446_p12 = por %p105_p9, %p104_p8 }
  0x1c   : > { %s1451_s4 = scalar_select %p38_p10, %s1304_s14, %s40_s24  }
  0x1d   : > { %s1826_s3 = scalar_select %p1446_p12, 1, 0 }
  0x1e   : > { %s1454_s5 = scalar_select %p92_p11, %s1292_s11, %s94_s27  }
  0x1f   : > { %p110_p13 = scmp.ne.s32.totalorder %s1288_s10, %s1284_s9  ;;  %p111_p0 = scmp.eq.s32.totalorder %s899_s21, 3 }
  0x20   : > { %p1021_p1 = scmp.lt.s32.totalorder %s1324_s19, 4  ;;  %s1464_s7 = sand.u32 1, %s1304_s14  }
  0x21   : > { %p1459_p2 = por %p111_p0, %p110_p13  ;;  %s991_s8 = smul.u32 192, %s1464_s7 }
  0x22   : > { %s1813_s12 = smul.u32 3072, %s1320_s18  ;;  %p1470_p4 = pnand %p1021_p1, %p1428_p3 }
  0x23   : > { %s1827_s6 = scalar_select %p1459_p2, 1, 0 }
  0x24   : > { %s1829_s0 = sld [smem:[#allocation21_spill]]  ;;  %s135_s27 = scalar_lea.vmem [#allocation7], %s991_s8 }
  0x25   : > { %s142_s29 = sshll.u32 %s135_s27, 4  ;;  %s132_s25 = scalar_lea.sflag [#allocation8], %s1464_s7  ;;  %s1483_s29 = int_to_ptr.vmem [resolvable:$true] %s142_s29 }
  0x26   : > { %p1160_p6 = pneg %p1470_p4 }
  0x2a   : > { %s1479_s26 = scalar_lea.hbm %s1829_s0, %s1813_s12  ;;  %s1163_s12 = scalar_lea.hbm %s1829_s0, 6144 }
  0x2b   : > { %s1158_s30 = scalar_lea.hbm %s1479_s26, 3072  ;;  %p1164_p10 = scmp.lt.u32.totalorder %s1479_s26, %s1829_s0 }
  0x2c   : > { %p1159_p5 = scmp.ne.s32.totalorder %s1479_s26, %s1158_s30  ;;  %p1165_p11 = scmp.lt.u32.totalorder %s1163_s12, %s1158_s30 }
  0x2d   : > { %p1167_p0 = scmp.lt.u32.totalorder %s1158_s30, %s1479_s26 }
  0x2e   : > { %p1161_p8 = pnand %p1160_p6, %p1159_p5  ;;  %p1166_p13 = por %p1165_p11, %p1164_p10 }
  0x30   : > { %p1162_p9 = pneg %p1161_p8  ;;  %p1168_p1 = por %p1167_p0, %p1166_p13 }
  0x32   : > { %p1169_p3 = pnand %p1168_p1, %p1162_p9 }
  0x34   : > { %1172 = shalt.err (!%p1169_p3)
}
  0x35   : > { %s1173_s27 = scalar_lea.vmem %s1483_s29, 3072  ;;  %s1334_s24 = smov [#allocation7]  }
  0x36   : > { %p1174_p5 = scmp.ne.s32.totalorder %s1483_s29, %s1173_s27  ;;  %s1178_s21 = sshll.u32 %s1334_s24, 4  ;;  %s1179_s21 = int_to_ptr.vmem [resolvable:$false] %s1178_s21 }
  0x37   : > { %s1180_s22 = scalar_lea.vmem %s1179_s21, 6144  ;;  %p1181_p12 = scmp.lt.s32.totalorder %s1483_s29, %s1179_s21 }
  0x38   : > { %p1176_p8 = pnand %p1174_p5, %p1160_p6  ;;  %p1182_p10 = scmp.lt.s32.totalorder %s1180_s22, %s1173_s27 }
  0x3a   : > { %p1177_p2 = pneg %p1176_p8  ;;  %p1183_p11 = por %p1182_p10, %p1181_p12 }
  0x3c   : > { %p1184_p13 = pnand %p1183_p11, %p1177_p2 }
  0x3e   : > { %1187 = shalt.err (!%p1184_p13)
}
  0x3f   : > { %s1818_s23 = smov 128   ;;  %s1336_s12 = smov 8  }
  0x40   : > { %1013 = dma.hbm_to_vmem [thread:$0]  (!%p1470_p4), %s1479_s26, 3072, %s1483_s29, %s132_s25, %s1818_s23, %s1818_s23, %s1336_s12  }
  0x41   : > { %p171_p12 = scmp.lt.s32.totalorder %s1324_s19, 5  ;;  %s1830_s30 = smul.u32 3072, %s1320_s18 }
  0x42   : > { %p1831_p2 = scmp.ge.s32.totalorder %s1324_s19, 1  ;;  %s156_s0 = scalar_lea.vmem [#allocation10], %s991_s8 }
  0x43   : > { %s1523_s21 = scalar_lea.hbm %s1811_s1, %s1830_s30  ;;  %s163_s17 = sshll.u32 %s156_s0, 4  ;;  %s1533_s17 = int_to_ptr.vmem [resolvable:$true] %s163_s17 }
  0x44   : > { %p1527_p3 = pnand %p1831_p2, %p171_p12  ;;  %s153_s26 = scalar_lea.sflag [#allocation11], %s1464_s7 }
  0x45   : > { %s1188_s29 = scalar_lea.hbm %s1523_s21, 3072  ;;  %s1193_s27 = scalar_lea.hbm %s1811_s1, 6144 }
  0x46   : > { %p1189_p9 = scmp.ne.s32.totalorder %s1523_s21, %s1188_s29  ;;  %p1194_p5 = scmp.lt.u32.totalorder %s1523_s21, %s1811_s1 }
  0x47   : > { %p1195_p8 = scmp.lt.u32.totalorder %s1193_s27, %s1188_s29  ;;  %p1197_p11 = scmp.lt.u32.totalorder %s1188_s29, %s1523_s21 }
  0x48   : > { %p1191_p0 = pnand %p1189_p9, %p1160_p6 }
  0x49   : > { %p1196_p10 = por %p1195_p8, %p1194_p5 }
  0x4a   : > { %p1192_p1 = pneg %p1191_p0 }
  0x4b   : > { %p1198_p13 = por %p1197_p11, %p1196_p10 }
  0x4d   : > { %p1199_p12 = pnand %p1198_p13, %p1192_p1 }
  0x4f   : > { %1202 = shalt.err (!%p1199_p12)
}
  0x50   : > { %s1203_s0 = scalar_lea.vmem %s1533_s17, 3072  ;;  %s1337_s8 = smov [#allocation10]  }
  0x51   : > { %p1204_p2 = scmp.ne.s32.totalorder %s1533_s17, %s1203_s0  ;;  %s1208_s25 = sshll.u32 %s1337_s8, 4  ;;  %s1209_s25 = int_to_ptr.vmem [resolvable:$false] %s1208_s25 }
  0x52   : > { %s1210_s23 = scalar_lea.vmem %s1209_s25, 6144  ;;  %p1211_p7 = scmp.lt.s32.totalorder %s1533_s17, %s1209_s25 }
  0x53   : > { %p1206_p9 = pnand %p1204_p2, %p1160_p6  ;;  %p1212_p5 = scmp.lt.s32.totalorder %s1210_s23, %s1203_s0 }
  0x55   : > { %p1207_p0 = pneg %p1206_p9  ;;  %p1213_p8 = por %p1212_p5, %p1211_p7 }
  0x57   : > { %p1214_p10 = pnand %p1213_p8, %p1207_p0 }
  0x59   : > { %1217 = shalt.err (!%p1214_p10)
}
  0x5a   : > { %s1833_s29 = smov 128   ;;  %175 = sbr.rel (%p1527_p3) target bundleno = 371 (0x173), region = 28 }
  0x5b   : > { %1016 = dma.hbm_to_vmem [thread:$0]  (!%p1470_p4), %s1523_s21, 3072, %s1533_s17, %s153_s26, %s1833_s29, %s1833_s29, %s1336_s12  }
  0x5c   : > { %s177_s30 = sand.u32 (!%p1527_p3), 1, %s1300_s13   ;;  %p1834_p7 = scmp.ne.s32.totalorder (!%p1527_p3), %s1825_s28, 0 }
  0x5d   : > { %s995_s27 = smul.u32 (!%p1527_p3), 192, %s177_s30  ;;  %s178_s24 = scalar_lea.sflag (!%p1527_p3), [#allocation8], %s177_s30 }
  0x5f   : > { %s1567_s0 = scalar_lea.vmem (!%p1527_p3), [#allocation7], %s995_s27 }
  0x61   : > { %1271 = dma.done.wait (%p1834_p7), %s178_s24, 3072  }
  0x62   : > { %1273 = vsyncadd (%p1834_p7), %s178_s24, 4294964224  ;;  %s187_s7 = scalar_lea.sflag [#allocation11], %s177_s30  ;;  %s1573_s20 = scalar_lea.vmem [#allocation10], %s995_s27 }
  0x63   : > { %1275 = dma.done.wait (%p1834_p7), %s187_s7, 3072  }
  0x64   : > { %1277 = vsyncadd (%p1834_p7), %s187_s7, 4294964224  ;;  %s213_s17 = sand.u32 1, %s1288_s10   ;;  %s1581_s12 = sshll.u32 %s1308_s15, 5 }
  0x65   : > { %s1585_s21 = smul.u32 96, %s213_s17  ;;  %s1588_s26 = smov 0  }
  0x67   : > { %s215_s22 = scalar_lea.vmem [#allocation12], %s1585_s21 }
  0x68 LB: >> { %s1594_s28 = sshll.u32 %s1328_s26, 3  ;;  %s223_s26 = sadd.s32 1, %s1328_s26   ;;  %s1328_s26 = sphi %s1588_s26, %s223_s26  }
  0x69   : >> { %s225_s8 = sadd.s32 %s1594_s28, %s1581_s12  ;;  %s750_s29 = scalar_lea.vmem [#allocation2], %s1594_s28 }
  0x6a   : >> { %s226_s25 = scalar_lea.vmem %s1573_s20, %s225_s8 [#allocation10]  ;;  %s237_s23 = scalar_lea.vmem %s1567_s0, %s225_s8 [#allocation7] }
  0x6b   : >> { %v238_v0 = vld [vmem:[%s237_s23] sm:$0xff]  ;;  %s753_s30 = scalar_lea.vmem [#allocation3], %s1594_s28  ;;  %s756_s27 = scalar_lea.vmem [#allocation4], %s1594_s28 }
  0x6c   : >> { %v919_v1 = vld [vmem:[%s237_s23 + $0x40] sm:$0xff]  ;;  %v916_v3 = vadd.f32 -0.5, %v238_v0  ;;  %s759_s24 = scalar_lea.vmem [#allocation5], %s1594_s28  ;;  %s276_s7 = scalar_lea.vmem [#allocation6], %s1594_s28 }
  0x6d   : >> { %v923_v2 = vld [vmem:[%s237_s23 + $0x80] sm:$0xff]  ;;  %v920_v4 = vadd.f32 -0.5, %v919_v1  ;;  %p220_p4 = scmp.ge.s32.totalorder %s223_s26, 4  }
  0x6e   : >> { %v924_v5 = vadd.f32 -0.5, %v923_v2  ;;  %v227_v6 = vld [vmem:[%s226_s25] sm:$0xff]  ;;  %v250_v14 = vmul.f32 -0.5, %v916_v3  ;;  %p933_p6 = scmp.ne.s32.totalorder (%p220_p4), %s1308_s15, 0 }
  0x6f   : >> { %v910_v7 = vld [vmem:[%s226_s25 + $0x40] sm:$0xff]  ;;  %v907_v9 = vadd.f32 -0.5, %v227_v6  ;;  %v246_v12 = vmul.f32 0.0, %v920_v4 }
  0x70   : >> { %v914_v8 = vld [vmem:[%s226_s25 + $0x80] sm:$0xff]  ;;  %v911_v10 = vadd.f32 -0.5, %v910_v7  ;;  %v248_v13 = vmul.f32 -1.0, %v924_v5  ;;  %v252_v15 = vmul.f32 -0.5, %v924_v5  ;;  %v251_v21 = vadd.f32 %v920_v4, %v250_v14 }
  0x71   : >> { %v915_v11 = vadd.f32 -0.5, %v914_v8  ;;  %v265_v18 = vmul.f32 -0.5, %v907_v9  ;;  %v247_v20 = vadd.f32 %v916_v3, %v246_v12  ;;  %v271_v22 = vmul.f32 0.66666, %v907_v9 }
  0x72   : >> { %v259_v16 = vmul.f32 0.0, %v911_v10  ;;  %v272_v23 = vmul.f32 0.66666, %v911_v10  ;;  %v253_v28 = vadd.f32 %v252_v15, %v251_v21  ;;  %222 = sbr.rel (!%p220_p4) target bundleno = 104 (0x68), region = 160 }
  0x73   : >> { %v261_v17 = vmul.f32 -1.0, %v915_v11  ;;  %v267_v19 = vmul.f32 -0.5, %v915_v11  ;;  %v266_v25 = vadd.f32 %v911_v10, %v265_v18  ;;  %v274_v26 = vmul.f32 0.66666, %v915_v11 }
  0x74   : >> { %v260_v24 = vadd.f32 %v907_v9, %v259_v16  ;;  %v249_v27 = vadd.f32 %v248_v13, %v247_v20  ;;  %v273_v29 = vadd.f32 %v272_v23, %v271_v22  ;;  %928 = vst [vmem:[%s753_s30 + $0x1] sm:$0xff] %v253_v28 }
  0x75   : >> { %v268_v31 = vadd.f32 %v267_v19, %v266_v25 }
  0x76   : >> { %v262_v30 = vadd.f32 %v261_v17, %v260_v24  ;;  %926 = vst [vmem:[%s750_s29 + $0x1] sm:$0xff] %v249_v27  ;;  %v275_v32 = vadd.f32 %v274_v26, %v273_v29 }
  0x77   : >> { %932 = vst [vmem:[%s759_s24 + $0x1] sm:$0xff] %v268_v31 }
  0x78   : >> { %930 = vst [vmem:[%s756_s27 + $0x1] sm:$0xff] %v262_v30  ;;  %277 = vst [vmem:[%s276_s7] sm:$0xff] %v275_v32 }
  0x79   : > { %281 = sbr.rel (%p933_p6) target bundleno = 128 (0x80), region = 47  ;;  %v1338_v33 = vmov (!%p933_p6), 0.0  }
  0x7a   : > { %282 = vst [vmem:[#allocation2] sm:$0x1] (!%p933_p6), %v1338_v33  ;;  %283 = vst [vmem:[#allocation3] sm:$0x1] (!%p933_p6), %v1338_v33 }
  0x7b   : > { %284 = vst [vmem:[#allocation4] sm:$0x1] (!%p933_p6), %v1338_v33  ;;  %285 = vst [vmem:[#allocation5] sm:$0x1] (!%p933_p6), %v1338_v33 }
  0x80 PF: > { %p934_p3 = scmp.le.s32.totalorder %s1308_s15, 0 }
  0x81   : > { %s935_s28 = sadd.s32 (!%p934_p3), 4294967295, %s1581_s12 }
  0x82   : > { %289 = sbr.rel (%p934_p3) target bundleno = 145 (0x91), region = 51  ;;  %s291_s8 = scalar_lea.vmem (!%p934_p3), %s1567_s0, %s935_s28 [#allocation7] }
  0x83   : > { %s310_s25 = scalar_lea.vmem (!%p934_p3), %s1573_s20, %s935_s28 [#allocation10]  ;;  %v292_v34 = vld [vmem:[%s291_s8] sm:$0x1] (!%p934_p3) }
  0x84   : > { %v937_v35 = vld [vmem:[%s291_s8 + $0x40] sm:$0x1] (!%p934_p3)  ;;  %v936_v37 = vadd.f32 (!%p934_p3), -0.5, %v292_v34 }
  0x85   : > { %v939_v36 = vld [vmem:[%s291_s8 + $0x80] sm:$0x1] (!%p934_p3)  ;;  %v938_v38 = vadd.f32 (!%p934_p3), -0.5, %v937_v35 }
  0x86   : > { %v940_v39 = vadd.f32 (!%p934_p3), -0.5, %v939_v36  ;;  %v311_v40 = vld [vmem:[%s310_s25] sm:$0x1] (!%p934_p3)  ;;  %v306_v46 = vmul.f32 (!%p934_p3), -0.5, %v936_v37 }
  0x87   : > { %v941_v41 = vadd.f32 (!%p934_p3), -0.5, %v311_v40  ;;  %v942_v42 = vld [vmem:[%s310_s25 + $0x40] sm:$0x1] (!%p934_p3)  ;;  %v302_v44 = vmul.f32 (!%p934_p3), 0.0, %v938_v38 }
  0x88   : > { %v944_v43 = vld [vmem:[%s310_s25 + $0x80] sm:$0x1] (!%p934_p3)  ;;  %v304_v45 = vmul.f32 (!%p934_p3), -1.0, %v940_v39  ;;  %v308_v47 = vmul.f32 (!%p934_p3), -0.5, %v940_v39  ;;  %v943_v48 = vadd.f32 (!%p934_p3), -0.5, %v942_v42  ;;  %v307_v52 = vadd.f32 (!%p934_p3), %v938_v38, %v306_v46 }
  0x89   : > { %v945_v49 = vadd.f32 -0.5, %v944_v43  ;;  %v323_v50 = vmul.f32 -0.5, %v941_v41  ;;  %v303_v51 = vadd.f32 %v936_v37, %v302_v44 }
  0x8a   : > { %v319_v53 = vmul.f32 0.0, %v943_v48  ;;  %v309_v58 = vadd.f32 %v308_v47, %v307_v52 }
  0x8b   : > { %v321_v54 = vmul.f32 -1.0, %v945_v49  ;;  %v324_v55 = vadd.f32 %v943_v48, %v323_v50  ;;  %v325_v56 = vmul.f32 -0.5, %v945_v49  ;;  %v305_v57 = vadd.f32 %v304_v45, %v303_v51 }
  0x8c   : > { %v320_v59 = vadd.f32 %v941_v41, %v319_v53  ;;  %328 = vst [vmem:[#allocation3] sm:$0x1] %v309_v58 }
  0x8d   : > { %v326_v60 = vadd.f32 %v325_v56, %v324_v55  ;;  %327 = vst [vmem:[#allocation2] sm:$0x1] %v305_v57 }
  0x8e   : > { %v322_v61 = vadd.f32 %v321_v54, %v320_v59 }
  0x8f   : > { %330 = vst [vmem:[#allocation5] sm:$0x1] %v326_v60 }
  0x90   : > { %329 = vst [vmem:[#allocation4] sm:$0x1] %v322_v61 }
  0x91 PF: > { %p946_p1 = scmp.ne.s32.totalorder %s1308_s15, 1 }
  0x92   : > { %v1339_v62 = vmov (!%p946_p1), 0.0  }
  0x93   : > { %334 = sbr.rel (%p946_p1) target bundleno = 154 (0x9a), region = 55  ;;  %335 = vst [vmem:[#allocation2 + $0x21] sm:$0x1] (!%p946_p1), %v1339_v62  ;;  %336 = vst [vmem:[#allocation3 + $0x21] sm:$0x1] (!%p946_p1), %v1339_v62 }
  0x94   : > { %337 = vst [vmem:[#allocation4 + $0x21] sm:$0x1] (!%p946_p1), %v1339_v62  ;;  %338 = vst [vmem:[#allocation5 + $0x21] sm:$0x1] (!%p946_p1), %v1339_v62 }
  0x9a PF: > { %p947_p11 = scmp.ge.s32.totalorder %s1308_s15, 1 }
  0x9b   : > { %s774_s26 = scalar_lea.vmem (!%p947_p11), %s1567_s0, %s1581_s12 [#allocation7]  ;;  %s783_s23 = scalar_lea.vmem (!%p947_p11), %s1573_s20, %s1581_s12 [#allocation10] }
  0x9c   : > { %342 = sbr.rel (%p947_p11) target bundleno = 170 (0xaa), region = 59  ;;  %v949_v63 = vld [vmem:[%s774_s26 + $0x20] sm:$0x1] (!%p947_p11) }
  0x9d   : > { %v952_v0 = vld [vmem:[%s774_s26 + $0x60] sm:$0x1] (!%p947_p11)  ;;  %v950_v2 = vadd.f32 (!%p947_p11), -0.5, %v949_v63 }
  0x9e   : > { %v955_v1 = vld [vmem:[%s774_s26 + $0xa0] sm:$0x1] (!%p947_p11)  ;;  %v953_v3 = vadd.f32 (!%p947_p11), -0.5, %v952_v0 }
  0x9f   : > { %v956_v4 = vadd.f32 (!%p947_p11), -0.5, %v955_v1  ;;  %v958_v5 = vld [vmem:[%s783_s23 + $0x20] sm:$0x1] (!%p947_p11)  ;;  %v359_v11 = vmul.f32 (!%p947_p11), -0.5, %v950_v2 }
  0xa0   : > { %v959_v6 = vadd.f32 (!%p947_p11), -0.5, %v958_v5  ;;  %v961_v7 = vld [vmem:[%s783_s23 + $0x60] sm:$0x1] (!%p947_p11)  ;;  %v355_v9 = vmul.f32 (!%p947_p11), 0.0, %v953_v3 }
  0xa1   : > { %v964_v8 = vld [vmem:[%s783_s23 + $0xa0] sm:$0x1] (!%p947_p11)  ;;  %v357_v10 = vmul.f32 (!%p947_p11), -1.0, %v956_v4  ;;  %v361_v12 = vmul.f32 (!%p947_p11), -0.5, %v956_v4  ;;  %v962_v13 = vadd.f32 (!%p947_p11), -0.5, %v961_v7  ;;  %v360_v17 = vadd.f32 (!%p947_p11), %v953_v3, %v359_v11 }
  0xa2   : > { %v965_v14 = vadd.f32 (!%p947_p11), -0.5, %v964_v8  ;;  %v376_v15 = vmul.f32 (!%p947_p11), -0.5, %v959_v6  ;;  %v356_v16 = vadd.f32 (!%p947_p11), %v950_v2, %v355_v9 }
  0xa3   : > { %v372_v18 = vmul.f32 0.0, %v962_v13  ;;  %v362_v23 = vadd.f32 %v361_v12, %v360_v17 }
  0xa4   : > { %v374_v19 = vmul.f32 -1.0, %v965_v14  ;;  %v377_v20 = vadd.f32 %v962_v13, %v376_v15  ;;  %v378_v21 = vmul.f32 -0.5, %v965_v14  ;;  %v358_v22 = vadd.f32 %v357_v10, %v356_v16 }
  0xa5   : > { %v373_v24 = vadd.f32 %v959_v6, %v372_v18  ;;  %381 = vst [vmem:[#allocation3 + $0x21] sm:$0x1] %v362_v23 }
  0xa6   : > { %v379_v25 = vadd.f32 %v378_v21, %v377_v20  ;;  %380 = vst [vmem:[#allocation2 + $0x21] sm:$0x1] %v358_v22 }
  0xa7   : > { %v375_v26 = vadd.f32 %v374_v19, %v373_v24 }
  0xa8   : > { %383 = vst [vmem:[#allocation5 + $0x21] sm:$0x1] %v379_v25 }
  0xa9   : > { %382 = vst [vmem:[#allocation4 + $0x21] sm:$0x1] %v375_v26 }
  0xaa PF: > { %v384_v27 = vlaneseq  ;;  %s1623_s0 = smov 0  }
  0xac   : > { %v1619_v28 = vand.u32 127, %v384_v27 }
  0xae   : > { %vm386_vm0 = vcmp.ge.s32.totalorder %v1619_v28, 1  ;;  %vm390_vm1 = vcmp.lt.s32.totalorder %v1619_v28, 127 }
  0xaf LB: >> { %s1629_s20 = sshll.u32 %s1332_s0, 3  ;;  %s1340_s30 = smov 127   ;;  %s1332_s0 = sphi %s1623_s0, %s397_s0  }
  0xb0   : >> { %s792_s12 = scalar_lea.vmem [#allocation2], %s1629_s20  ;;  %s795_s29 = scalar_lea.vmem [#allocation3], %s1629_s20 }
  0xb1   : >> { %v412_v29 = vld [vmem:[%s792_s12] sm:$0xff]  ;;  %s1341_s27 = smov 1   ;;  %s801_s24 = scalar_lea.vmem [#allocation5], %s1629_s20 }
  0xb2   : >> { %v1632_v30 = vld [vmem:[%s792_s12 + $0x1] sm:$0xff]  ;;  %455 = vrot.lane.b32.xlu1 %v412_v29, %s1340_s30  ;;  %419 = vrot.lane.b32.xlu0 %v412_v29, %s1341_s27  ;;  %s798_s7 = scalar_lea.vmem [#allocation4], %s1629_s20  ;;  %s596_s28 = scalar_lea.vmem [#allocation6], %s1629_s20 }
  0xb3   : >> { %v1635_v31 = vld [vmem:[%s795_s29 + $0x1] sm:$0xff]  ;;  %v442_v32 = vsub.f32 %v412_v29, %v1632_v30  ;;  %v408_v0 = vmul.f32 %v1632_v30, %v1632_v30  ;;  %s604_s8 = scalar_lea.vmem %s215_s22, %s1629_s20 [#allocation12]  ;;  %s397_s0 = sadd.s32 1, %s1332_s0  }
  0xb4   : >> { %v414_v33 = vld [vmem:[%s795_s29] sm:$0xff]  ;;  %v409_v63 = vmul.f32 %v1635_v31, %v1635_v31  ;;  %p394_p13 = scmp.ge.s32.totalorder %s397_s0, 4  }
  0xb5   : >> { %v978_v34 = vld [vmem:[%s795_s29 + $0x2] sm:$0xff]  ;;  %v444_v35 = vsub.f32 %v414_v33, %v1635_v31  ;;  %v443_v38 = vmul.f32 %v442_v32, %v442_v32  ;;  %s622_s25 = scalar_lea.sflag (%p394_p13), [#allocation9], %s213_s17 }
  0xb6   : >> { %v558_v36 = vsub.f32 %v978_v34, %v1635_v31  ;;  %v976_v37 = vld [vmem:[%s792_s12 + $0x2] sm:$0xff]  ;;  %457 = vrot.lane.b32.xlu1 %v414_v33, %s1340_s30  ;;  %421 = vrot.lane.b32.xlu0 %v414_v33, %s1341_s27  ;;  %v410_v7 = vadd.f32 %v409_v63, %v408_v0 }
  0xb7   : >> { %v556_v39 = vsub.f32 %v976_v37, %v1632_v30  ;;  %v445_v40 = vmul.f32 %v444_v35, %v444_v35  ;;  %v418_v50 = vld [vmem:[%s801_s24] sm:$0xff] }
  0xb8   : >> { %v559_v41 = vmul.f32 %v558_v36, %v558_v36  ;;  %v416_v51 = vld [vmem:[%s798_s7] sm:$0xff] }
  0xb9   : >> { %v557_v42 = vmul.f32 %v556_v39, %v556_v39  ;;  %v446_v43 = vadd.f32 %v445_v40, %v443_v38  ;;  %v982_v55 = vld [vmem:[%s801_s24 + $0x2] sm:$0xff] }
  0xba   : >> { %480 = vrot.lane.b32.xlu1 %v1635_v31, %s1341_s27  ;;  %478 = vrot.lane.b32.xlu0 %v1632_v30, %s1341_s27  ;;  %v980_v56 = vld [vmem:[%s798_s7 + $0x2] sm:$0xff] }
  0xbb   : >> { %v560_v44 = vadd.f32 %v559_v41, %v557_v42  ;;  %v447_v45 = vmul.f32 -1.0, %v446_v43  ;;  %v1679_v59 = vld [vmem:[%s801_s24 + $0x1] sm:$0xff] }
  0xbc   : >> { %v1681_v60 = vld [vmem:[%s798_s7 + $0x1] sm:$0xff] }
  0xbd   : >> { %v561_v46 = vmul.f32 -1.0, %v560_v44  ;;  %v448_v47 = vmul.f32 1.442695, %v447_v45 }
  0xbe   : >> { %503 = vrot.lane.b32.xlu1 %v1635_v31, %s1340_s30  ;;  %501 = vrot.lane.b32.xlu0 %v1632_v30, %s1340_s30 }
  0xbf   : >> { %v562_v48 = vmul.f32 1.442695, %v561_v46  ;;  %1140 = vpow2.f32 %v448_v47 }
  0xc1   : >> { %1142 = vpow2.f32 %v562_v48 }
  0xc2   : >> { %535 = vrot.lane.b32.xlu1 %v978_v34, %s1341_s27  ;;  %533 = vrot.lane.b32.xlu0 %v976_v37, %s1341_s27 }
  0xc6   : >> { %571 = vrot.lane.b32.xlu1 %v978_v34, %s1340_s30  ;;  %569 = vrot.lane.b32.xlu0 %v976_v37, %s1340_s30 }
  0xc9   : >> { %v1657_v49 = vpop.eup %1140 }
  0xca   : >> { %v1664_v53 = vmul.f32 %v1657_v49, %v418_v50  ;;  %v1667_v54 = vmul.f32 %v1657_v49, %v416_v51  ;;  %425 = vrot.lane.b32.xlu1 %v418_v50, %s1341_s27  ;;  %423 = vrot.lane.b32.xlu0 %v416_v51, %s1341_s27 }
  0xcb   : >> { %v1661_v52 = vpop.eup %1142 }
  0xcc   : >> { %v1670_v57 = vmul.f32 %v1661_v52, %v982_v55  ;;  %v1673_v58 = vmul.f32 %v1661_v52, %v980_v56 }
  0xce   : >> { %461 = vrot.lane.b32.xlu1 %v418_v50, %s1340_s30  ;;  %459 = vrot.lane.b32.xlu0 %v416_v51, %s1340_s30 }
  0xd2   : >> { %484 = vrot.lane.b32.xlu1 %v1679_v59, %s1341_s27  ;;  %482 = vrot.lane.b32.xlu0 %v1681_v60, %s1341_s27 }
  0xd6   : >> { %507 = vrot.lane.b32.xlu1 %v1679_v59, %s1340_s30  ;;  %505 = vrot.lane.b32.xlu0 %v1681_v60, %s1340_s30 }
  0xda   : >> { %539 = vrot.lane.b32.xlu1 %v982_v55, %s1341_s27  ;;  %537 = vrot.lane.b32.xlu0 %v980_v56, %s1341_s27 }
  0xde   : >> { %575 = vrot.lane.b32.xlu1 %v982_v55, %s1340_s30  ;;  %573 = vrot.lane.b32.xlu0 %v980_v56, %s1340_s30 }
 0x124   : >> { %v456_v61 = vpop.permute.xlu1 %455  ;;  %v420_v62 = vpop.permute.xlu0 %419 }
 0x125   : >> { %v463_v1 = vsub.f32 %v456_v61, %v1632_v30  ;;  %v427_v2 = vsub.f32 %v420_v62, %v1632_v30 }
 0x127   : >> { %v464_v8 = vmul.f32 %v463_v1, %v463_v1  ;;  %v428_v9 = vmul.f32 %v427_v2, %v427_v2 }
 0x128   : >> { %v458_v3 = vpop.permute.xlu1 %457  ;;  %v422_v4 = vpop.permute.xlu0 %421 }
 0x129   : >> { %v465_v5 = vsub.f32 %v458_v3, %v1635_v31  ;;  %v429_v6 = vsub.f32 %v422_v4, %v1635_v31 }
 0x12b   : >> { %v466_v10 = vmul.f32 %v465_v5, %v465_v5  ;;  %v430_v11 = vmul.f32 %v429_v6, %v429_v6 }
 0x12c   : >> { %v481_v12 = vpop.permute.xlu1 %480  ;;  %v479_v13 = vpop.permute.xlu0 %478 }
 0x12d   : >> { %v467_v14 = vadd.f32 %v466_v10, %v464_v8  ;;  %v431_v15 = vadd.f32 %v430_v11, %v428_v9  ;;  %v488_v16 = vsub.f32 %v481_v12, %v1635_v31  ;;  %v486_v17 = vsub.f32 %v479_v13, %v1632_v30 }
 0x12f   : >> { %v468_v18 = vsel %vm390_vm1, %v467_v14, %v410_v7  ;;  %v432_v19 = vsel %vm386_vm0, %v431_v15, %v410_v7  ;;  %v489_v20 = vmul.f32 %v488_v16, %v488_v16  ;;  %v487_v21 = vmul.f32 %v486_v17, %v486_v17 }
 0x130   : >> { %v469_v22 = vmul.f32 -1.0, %v468_v18  ;;  %v433_v23 = vmul.f32 -1.0, %v432_v19  ;;  %v504_v24 = vpop.permute.xlu1 %503  ;;  %v502_v25 = vpop.permute.xlu0 %501 }
 0x131   : >> { %v490_v26 = vadd.f32 %v489_v20, %v487_v21  ;;  %v511_v27 = vsub.f32 %v504_v24, %v1635_v31  ;;  %v509_v29 = vsub.f32 %v502_v25, %v1632_v30 }
 0x132   : >> { %v470_v32 = vmul.f32 1.442695, %v469_v22  ;;  %v434_v33 = vmul.f32 1.442695, %v433_v23 }
 0x133   : >> { %v491_v34 = vsel %vm386_vm0, %v490_v26, %v410_v7  ;;  %v512_v35 = vmul.f32 %v511_v27, %v511_v27  ;;  %v510_v36 = vmul.f32 %v509_v29, %v509_v29 }
 0x134   : >> { %1144 = vpow2.f32 %v470_v32  ;;  %v492_v37 = vmul.f32 -1.0, %v491_v34  ;;  %v536_v38 = vpop.permute.xlu1 %535  ;;  %v534_v39 = vpop.permute.xlu0 %533 }
 0x135   : >> { %1146 = vpow2.f32 %v434_v33  ;;  %v513_v40 = vadd.f32 %v512_v35, %v510_v36  ;;  %v543_v41 = vsub.f32 %v536_v38, %v1635_v31  ;;  %v541_v42 = vsub.f32 %v534_v39, %v1632_v30 }
 0x136   : >> { %v493_v43 = vmul.f32 1.442695, %v492_v37 }
 0x137   : >> { %v514_v44 = vsel %vm390_vm1, %v513_v40, %v410_v7  ;;  %v544_v45 = vmul.f32 %v543_v41, %v543_v41  ;;  %v542_v46 = vmul.f32 %v541_v42, %v541_v42 }
 0x138   : >> { %1148 = vpow2.f32 %v493_v43  ;;  %v515_v47 = vmul.f32 -1.0, %v514_v44  ;;  %v572_v48 = vpop.permute.xlu1 %571  ;;  %v570_v50 = vpop.permute.xlu0 %569 }
 0x139   : >> { %v545_v51 = vadd.f32 %v544_v45, %v542_v46  ;;  %v579_v55 = vsub.f32 %v572_v48, %v1635_v31  ;;  %v577_v56 = vsub.f32 %v570_v50, %v1632_v30 }
 0x13a   : >> { %v516_v61 = vmul.f32 1.442695, %v515_v47 }
 0x13b   : >> { %v546_v62 = vsel %vm386_vm0, %v545_v51, %v410_v7  ;;  %v580_v63 = vmul.f32 %v579_v55, %v579_v55  ;;  %v578_v0 = vmul.f32 %v577_v56, %v577_v56 }
 0x13c   : >> { %1150 = vpow2.f32 %v516_v61  ;;  %v547_v1 = vmul.f32 -1.0, %v546_v62  ;;  %v426_v2 = vpop.permute.xlu1 %425  ;;  %v424_v3 = vpop.permute.xlu0 %423 }
 0x13d   : >> { %v581_v4 = vadd.f32 %v580_v63, %v578_v0 }
 0x13e   : >> { %v1145_v5 = vpop.eup %1144  ;;  %v548_v6 = vmul.f32 1.442695, %v547_v1 }
 0x13f   : >> { %v1147_v8 = vpop.eup %1146  ;;  %v582_v9 = vsel %vm390_vm1, %v581_v4, %v410_v7  ;;  %v473_v15 = vsel %vm390_vm1, %v1145_v5, 0.0 }
 0x140   : >> { %v436_v31 = vadd.f32 1.0, %v1147_v8  ;;  %1152 = vpow2.f32 %v548_v6  ;;  %v583_v30 = vmul.f32 -1.0, %v582_v9  ;;  %v437_v10 = vsel %vm386_vm0, %v1147_v8, 0.0  ;;  %v462_v11 = vpop.permute.xlu1 %461  ;;  %v460_v12 = vpop.permute.xlu0 %459 }
 0x141   : >> { %v440_v13 = vmul.f32 %v437_v10, %v426_v2  ;;  %v438_v14 = vmul.f32 %v437_v10, %v424_v3  ;;  %v476_v22 = vmul.f32 %v473_v15, %v462_v11  ;;  %v474_v23 = vmul.f32 %v473_v15, %v460_v12 }
 0x142   : >> { %v1149_v16 = vpop.eup %1148  ;;  %v450_v17 = vadd.f32 %v1657_v49, %v436_v31  ;;  %v584_v18 = vmul.f32 1.442695, %v583_v30 }
 0x143   : >> { %v441_v19 = vadd.f32 %v1679_v59, %v440_v13  ;;  %v439_v7 = vadd.f32 %v1681_v60, %v438_v14  ;;  %v496_v20 = vsel %vm386_vm0, %v1149_v16, 0.0 }
 0x144   : >> { %v472_v21 = vadd.f32 %v1145_v5, %v450_v17  ;;  %1154 = vpow2.f32 %v584_v18  ;;  %v485_v24 = vpop.permute.xlu1 %484  ;;  %v483_v25 = vpop.permute.xlu0 %482  ;;  %v597_v5 = vld [vmem:[%s596_s28] sm:$0xff] }
 0x145   : >> { %v454_v26 = vadd.f32 %v1664_v53, %v441_v19  ;;  %v452_v27 = vadd.f32 %v1667_v54, %v439_v7  ;;  %v499_v29 = vmul.f32 %v496_v20, %v485_v24  ;;  %v497_v49 = vmul.f32 %v496_v20, %v483_v25 }
 0x146   : >> { %v1151_v32 = vpop.eup %1150  ;;  %v495_v33 = vadd.f32 %v1149_v16, %v472_v21  ;;  %v598_v31 = vmul.f32 0.500005, %v597_v5 }
 0x147   : >> { %v477_v59 = vadd.f32 %v476_v22, %v454_v26  ;;  %v475_v34 = vadd.f32 %v474_v23, %v452_v27  ;;  %v519_v60 = vsel %vm390_vm1, %v1151_v32, 0.0 }
 0x148   : >> { %v518_v35 = vadd.f32 %v1151_v32, %v495_v33  ;;  %v508_v36 = vpop.permute.xlu1 %507  ;;  %v506_v37 = vpop.permute.xlu0 %505 }
 0x149   : >> { %v500_v38 = vadd.f32 %v499_v29, %v477_v59  ;;  %v498_v39 = vadd.f32 %v497_v49, %v475_v34  ;;  %v522_v40 = vmul.f32 %v519_v60, %v508_v36  ;;  %v520_v41 = vmul.f32 %v519_v60, %v506_v37 }
 0x14a   : >> { %v1153_v42 = vpop.eup %1152 }
 0x14b   : >> { %v550_v53 = vadd.f32 %v1153_v42, %v518_v35  ;;  %v551_v54 = vsel %vm386_vm0, %v1153_v42, 0.0  ;;  %v523_v43 = vadd.f32 %v522_v40, %v500_v38  ;;  %v521_v46 = vadd.f32 %v520_v41, %v498_v39 }
 0x14c   : >> { %v540_v44 = vpop.permute.xlu1 %539  ;;  %v538_v45 = vpop.permute.xlu0 %537 }
 0x14d   : >> { %v554_v47 = vmul.f32 %v551_v54, %v540_v44  ;;  %v552_v48 = vmul.f32 %v551_v54, %v538_v45  ;;  %v564_v50 = vadd.f32 %v1661_v52, %v550_v53 }
 0x14e   : >> { %v1155_v51 = vpop.eup %1154 }
 0x14f   : >> { %v555_v55 = vadd.f32 %v554_v47, %v523_v43  ;;  %v553_v56 = vadd.f32 %v552_v48, %v521_v46  ;;  %v586_v61 = vadd.f32 %v1155_v51, %v564_v50  ;;  %v587_v1 = vsel %vm390_vm1, %v1155_v51, 0.0 }
 0x150   : >> { %v576_v0 = vpop.permute.xlu1 %575  ;;  %v574_v2 = vpop.permute.xlu0 %573 }
 0x151   : >> { %v568_v62 = vadd.f32 %v1670_v57, %v555_v55  ;;  %1156 = vrcp.f32 %v586_v61  ;;  %v566_v63 = vadd.f32 %v1673_v58, %v553_v56  ;;  %v590_v3 = vmul.f32 %v587_v1, %v576_v0 }
 0x152   : >> { %v588_v4 = vmul.f32 %v587_v1, %v574_v2 }
 0x153   : >> { %v591_v6 = vadd.f32 %v590_v3, %v568_v62 }
 0x154   : >> { %v589_v52 = vadd.f32 %v588_v4, %v566_v63 }
 0x15b   : >> { %v1157_v8 = vpop.eup %1156 }
 0x15c   : >> { %v595_v9 = vmul.f32 %v1157_v8, %v591_v6  ;;  %v594_v57 = vmul.f32 %v1157_v8, %v589_v52 }
 0x15e   : >> { %v599_v30 = vmul.f32 0.5, %v594_v57  ;;  %v606_v10 = vmul.f32 -0.0, %v594_v57  ;;  %v614_v58 = vmul.f32 -0.5, %v594_v57  ;;  %v601_v11 = vmul.f32 -0.33333334, %v595_v9 }
 0x15f   : >> { %v608_v12 = vmul.f32 0.6666667, %v595_v9 }
 0x160   : >> { %v600_v13 = vadd.f32 %v599_v30, %v598_v31  ;;  %v607_v14 = vadd.f32 %v606_v10, %v598_v31  ;;  %v615_v15 = vadd.f32 %v614_v58, %v598_v31 }
 0x161   : > { %396 = sbr.rel (!%p394_p13) target bundleno = 175 (0xaf), region = 171 }
 0x162   : >> { %v602_v16 = vadd.f32 %v601_v11, %v600_v13  ;;  %v609_v17 = vadd.f32 %v608_v12, %v607_v14  ;;  %v616_v18 = vadd.f32 %v615_v15, %v601_v11 }
 0x164   : >> { %v603_v19 = vadd.f32 0.5, %v602_v16  ;;  %v610_v7 = vadd.f32 0.5, %v609_v17  ;;  %v617_v20 = vadd.f32 0.5, %v616_v18 }
 0x166   : >> { %605 = vst [vmem:[%s604_s8] sm:$0xff] %v603_v19  ;;  %984 = vst [vmem:[%s604_s8 + $0x20] sm:$0xff] %v610_v7 }
 0x167   : >> { %986 = vst [vmem:[%s604_s8 + $0x40] sm:$0xff] %v617_v20 }
 0x168   : > { %s987_s26 = sshll.u32 %s1308_s15, 2  ;;  %s997_s23 = smul.u32 24, %s1312_s16 }
 0x169   : > { %s653_s20 = sshll.u32 %s215_s22, 4  ;;  %s1342_s29 = smov 512   ;;  %s654_s20 = int_to_ptr.vmem [resolvable:$true] %s653_s20 }
 0x16a   : > { %s634_s12 = sadd.s32 %s997_s23, %s987_s26  ;;  %p1835_p12 = scmp.ne.s32.totalorder %s1826_s3, 0 }
 0x16b   : > { %s988_s0 = sshll.u32 %s634_s12, 7  ;;  %s1343_s24 = smov 1024  }
 0x16c   : > { %1002 = sst [smem:[#allocation14]] (%p1835_p12), %s1342_s29  ;;  %s636_s27 = scalar_lea.hbm %s1812_s2, %s988_s0 }
 0x16d   : > { %1003 = sst [smem:[#allocation14 + $0x1]] (%p1835_p12), %s1343_s24  ;;  %s1344_s7 = smov 4  }
 0x16e   : > { %1004 = sst [smem:[#allocation14 + $0x2]] (%p1835_p12), %s1344_s7  ;;  %s1345_s15 = smov 128  }
 0x16f   : > { %1005 = sst [smem:[#allocation14 + $0x3]] (%p1835_p12), %s1345_s15  ;;  %s1346_s16 = smov 8  }
 0x170   : > { %1006 = sst [smem:[#allocation14 + $0x4]] (%p1835_p12), %s1345_s15  ;;  %s1347_s21 = smov [#allocation13]  }
 0x171   : > { %1007 = sst [smem:[#allocation14 + $0x5]] (%p1835_p12), %s1346_s16  ;;  %s1348_s22 = smov 0  }
 0x172   : > { %1008 = dma.general (%p1835_p12), %s654_s20, 1536, %s636_s27, %s622_s25, %s1347_s21, [#allocation14], %s1348_s22, 0  }
 0x173 PF: > { %p1022_p2 = scmp.ge.s32.totalorder %s1324_s19, 2  ;;  %s681_s28 = sand.u32 1, %s1284_s9  }
 0x174   : > { %p1836_p9 = scmp.ne.s32.totalorder %s1827_s6, 0  ;;  %s682_s8 = scalar_lea.sflag [#allocation9], %s681_s28 }
 0x176   : > { %p1018_p0 = pnand %p1022_p2, %p1836_p9 }
 0x178   : > { %1279 = dma.done.wait (!%p1018_p0), %s682_s8, 1536  }
 0x179   : > { %1281 = vsyncadd (!%p1018_p0), %s682_s8, 4294965760  ;;  %s21_s19 = sadd.s32 1, %s1324_s19   ;;  %s1837_s15 = sld [smem:[#allocation18_spill]] }
 0x17a   : > { %p18_p5 = scmp.ge.s32.totalorder %s21_s19, 6   ;;  %s1838_s17 = sld [smem:[#allocation19_spill]] }
 0x17b   : > { %s1839_s3 = sld [smem:[#allocation20_spill]]  ;;  %s1840_s9 = smov %s1288_s10 }
 0x17c   : > { %s1841_s10 = smov %s1292_s11  ;;  %s1842_s11 = smov %s1454_s5 }
 0x17d   : > { %s1843_s12 = smov %s1300_s13  ;;  %s1844_s13 = smov %s1304_s14 }
 0x17e   : > { %s1845_s14 = smov %s1451_s4  ;;  %s1846_s16 = smov %s1320_s18 }
 0x17f   :  { %20 = sbr.rel (!%p18_p5) target bundleno = 13 (0xd), region = 182 }
 0x181   : > { %s1847_s18 = smov %s1839_s3 }
 0x186   :  { %687 = vsyncpa [#allocation8], 1 }
 0x187   :  { %689 = vsyncpa [#allocation8 + $0x1], 1 }
 0x188   :  { %690 = vsyncpa [#allocation11], 1 }
 0x189   :  { %692 = vsyncpa [#allocation11 + $0x1], 1 }
 0x18a   :  { %693 = vsyncpa [#allocation9], 1 }
 0x18b   :  { %695 = vsyncpa [#allocation9 + $0x1], 1 }

</bundles_post_ra>
